<compile_context>
chip_gen: v7x
topology: tpu7x:2x2x1
jax: 0.10.0
libtpu: 0.0.40
codegen_flags: <defaults>
</compile_context>

<pallas_src>
import jax
import jax.numpy as jnp
from jax.experimental import pallas as pl
from jax.experimental.pallas import tpu as pltpu

D_IN, D_H1, D_H2, D_OUT = 768, 512, 256, 10
D_OUT_PAD = 128          # lane-dense final projection width (sliced back to 10 in the wrapper)
LN_EPS = 1e-5
LRELU_SLOPE = 0.01


def _layernorm(h, gamma, beta):
    # One-pass moments: halves the cross-lane reductions vs. the two-pass (h - mu)**2 form.
    mu = jnp.mean(h, axis=-1, keepdims=True)
    ms = jnp.mean(h * h, axis=-1, keepdims=True)
    var = jnp.maximum(ms - mu * mu, 0.0)
    return (h - mu) * jax.lax.rsqrt(var + LN_EPS) * gamma + beta


def _leaky_relu(h):
    return jnp.where(h > 0, h, LRELU_SLOPE * h)


def mixer_head_kernel(x_ref,
                      w1_ref, b1_ref, g1_ref, be1_ref,
                      w2_ref, b2_ref, g2_ref, be2_ref,
                      w3_ref, b3_ref,
                      o_ref):
    # fc1 -> ln1 -> leaky_relu   (dropout = identity at inference)
    # In-kernel bf16 cast of x: VPU work hidden under the MXU (no wrapper-side XLA pass over x).
    x = x_ref[...].astype(jnp.bfloat16)
    h = jnp.dot(x, w1_ref[...], preferred_element_type=jnp.float32)
    h = h + b1_ref[...]
    h = _leaky_relu(_layernorm(h, g1_ref[...], be1_ref[...]))

    # fc2 -> ln2 -> leaky_relu
    h = jnp.dot(h.astype(jnp.bfloat16), w2_ref[...], preferred_element_type=jnp.float32)
    h = h + b2_ref[...]
    h = _leaky_relu(_layernorm(h, g2_ref[...], be2_ref[...]))

    # fc3 (padded to D_OUT_PAD lane-dense columns; real logits are [:, :D_OUT])
    h = jnp.dot(h.astype(jnp.bfloat16), w3_ref[...], preferred_element_type=jnp.float32)
    h = h + b3_ref[...]

    # TODO(synk): nn.Dropout(0.2) is identity at inference; training-mode dropout masks not implemented.
    o_ref[...] = h.astype(o_ref.dtype)


def _round_up(n, m):
    return ((n + m - 1) // m) * m


def prepare_params(params):
    """One-time parameter preprocessing (hoisted out of the per-call hot path):
    bf16 weight casts + lane-dense padding of the final projection to 128 columns."""
    (w1, b1, g1, be1, w2, b2, g2, be2, w3, b3) = params
    w3p = jnp.zeros((D_H2, D_OUT_PAD), jnp.float32).at[:, :D_OUT].set(w3)
    b3p = jnp.zeros((1, D_OUT_PAD), jnp.float32).at[:, :D_OUT].set(b3)
    return (w1.astype(jnp.bfloat16), b1, g1, be1,
            w2.astype(jnp.bfloat16), b2, g2, be2,
            w3p.astype(jnp.bfloat16), b3p)


def mlp_mixer_head1(x, prepared_params, *, tb=1024):
    """x: [B, 768] float32 (bf16 also accepted).  Returns [B, 10] float32 logits."""
    B = x.shape[0]

    # Sublane-aligned batch tile: round small batches to 16 (bf16 sublane packing), not 256 —
    # the MXU streams M, so only sublane alignment matters.
    tb = min(tb, _round_up(B, 16))
    # v7x megacore: guarantee >= 2 grid steps on the "parallel" batch axis when the batch is
    # large enough, so both TensorCores get work.
    if B >= 512:
        tb = min(tb, _round_up((B + 1) // 2, 16))
    B_pad = _round_up(B, tb)

    (w1b, b1, g1, be1, w2b, b2, g2, be2, w3b, b3p) = prepared_params

    # No dtype cast here; only zero-pad the batch if needed (padded rows are finite through
    # LayerNorm: var=0 -> rsqrt(eps), and are sliced off at the end).
    if B_pad != B:
        x = jnp.pad(x, ((0, B_pad - B), (0, 0)))

    # Constant-index parameter blocks: single-buffer them (they are never re-fetched across
    # grid steps), reclaiming ~1.2 MiB of duplicate weight buffering.
    def const_spec(shape):
        return pl.BlockSpec(shape, lambda i: (0, 0), pipeline_mode=pl.Buffered(1))

    out = pl.pallas_call(
        mixer_head_kernel,
        out_shape=jax.ShapeDtypeStruct((B_pad, D_OUT_PAD), jnp.float32),
        grid_spec=pltpu.PrefetchScalarGridSpec(
            num_scalar_prefetch=0,
            grid=(B_pad // tb,),
            in_specs=[
                pl.BlockSpec((tb, D_IN), lambda i: (i, 0)),     # x (native dtype, cast in-kernel)
                const_spec((D_IN, D_H1)),                       # w1 (bf16)
                const_spec((1, D_H1)),                          # b1
                const_spec((1, D_H1)),                          # ln1 gamma
                const_spec((1, D_H1)),                          # ln1 beta
                const_spec((D_H1, D_H2)),                       # w2 (bf16)
                const_spec((1, D_H2)),                          # b2
                const_spec((1, D_H2)),                          # ln2 gamma
                const_spec((1, D_H2)),                          # ln2 beta
                const_spec((D_H2, D_OUT_PAD)),                  # w3 (bf16, lane-padded)
                const_spec((1, D_OUT_PAD)),                     # b3 (lane-padded)
            ],
            out_specs=pl.BlockSpec((tb, D_OUT_PAD), lambda i: (i, 0)),
        ),
        compiler_params=pltpu.CompilerParams(
            dimension_semantics=("parallel",),
            # tb=1024 working set is ~12-14 MiB + temporaries; 48 MiB covers the v5e 16 MiB
            # scoped default while staying inside v7x's 64 MiB physical VMEM.
            vmem_limit_bytes=48 * 1024 * 1024,
        ),
    )(x, w1b, b1, g1, be1, w2b, b2, g2, be2, w3b, b3p)

    return out[:B, :D_OUT]


def init_params(key):
    """Deterministic synthetic parameters (same shapes/init style as the PyTorch module)."""
    ks = jax.random.split(key, 6)

    def lin(kw, kb, fan_in, fan_out):
        bound = 1.0 / (fan_in ** 0.5)
        w = jax.random.uniform(kw, (fan_in, fan_out), jnp.float32, -bound, bound)
        b = jax.random.uniform(kb, (1, fan_out), jnp.float32, -bound, bound)
        return w, b

    w1, b1 = lin(ks[0], ks[1], D_IN, D_H1)
    w2, b2 = lin(ks[2], ks[3], D_H1, D_H2)
    w3, b3 = lin(ks[4], ks[5], D_H2, D_OUT)

    # nn.LayerNorm default init: weight=1, bias=0
    g1, be1 = jnp.ones((1, D_H1), jnp.float32), jnp.zeros((1, D_H1), jnp.float32)
    g2, be2 = jnp.ones((1, D_H2), jnp.float32), jnp.zeros((1, D_H2), jnp.float32)

    return (w1, b1, g1, be1, w2, b2, g2, be2, w3, b3)


def reference(x, params):
    """Pure-JAX f32 reference (PyTorch forward semantics, dropout = identity)."""
    (w1, b1, g1, be1, w2, b2, g2, be2, w3, b3) = params

    def ln(h, gamma, beta):
        mu = jnp.mean(h, axis=-1, keepdims=True)
        var = jnp.mean((h - mu) ** 2, axis=-1, keepdims=True)
        return (h - mu) * jax.lax.rsqrt(var + LN_EPS) * gamma + beta

    h = x @ w1 + b1
    h = _leaky_relu(ln(h, g1, be1))
    h = h @ w2 + b2
    h = _leaky_relu(ln(h, g2, be2))
    return h @ w3 + b3


if __name__ == "__main__":
    key = jax.random.PRNGKey(0)
    kx, kp = jax.random.split(key)

    B = 8
    x = jax.random.normal(kx, (B, D_IN), jnp.float32)
    params = init_params(kp)
    prepared = prepare_params(params)   # one-time param prep (bf16 casts + lane padding)

    out = mlp_mixer_head1(x, prepared)
    out = jax.block_until_ready(out)

    ref = reference(x, params)
    assert out.shape == (B, D_OUT)
    # bf16 matmul operands vs. f32 reference -> relaxed tolerance.
    err = jnp.max(jnp.abs(out - ref))
    assert jnp.allclose(out, ref, atol=5e-2, rtol=5e-2), f"max abs err {err}"

    print("KERNEL_OK")
</pallas_src>

<mosaic_0001>
module attributes {stable_mosaic.version = 11 : i64} {
  func.func @mixer_head_kernel(%arg0: i32, %arg1: memref<16x768xf32, #tpu.memory_space<vmem>>, %arg2: memref<768x512xbf16, #tpu.memory_space<vmem>>, %arg3: memref<1x512xf32, #tpu.memory_space<vmem>>, %arg4: memref<1x512xf32, #tpu.memory_space<vmem>>, %arg5: memref<1x512xf32, #tpu.memory_space<vmem>>, %arg6: memref<512x256xbf16, #tpu.memory_space<vmem>>, %arg7: memref<1x256xf32, #tpu.memory_space<vmem>>, %arg8: memref<1x256xf32, #tpu.memory_space<vmem>>, %arg9: memref<1x256xf32, #tpu.memory_space<vmem>>, %arg10: memref<256x128xbf16, #tpu.memory_space<vmem>>, %arg11: memref<1x128xf32, #tpu.memory_space<vmem>>, %arg12: memref<16x128xf32, #tpu.memory_space<vmem>>) attributes {dimension_semantics = [#tpu.dimension_semantics<parallel>], iteration_bounds = array<i64: 1>, scalar_prefetch = 0 : i64, scratch_operands = 0 : i64, tpu.core_type = #tpu.core_type<tc>, window_params = [{transform_indices = @transform_0, window_bounds = array<i64: 16, 768>}, {pipeline_mode = #tpu.pipeline_mode<synchronous>, transform_indices = @transform_1, window_bounds = array<i64: 768, 512>}, {pipeline_mode = #tpu.pipeline_mode<synchronous>, transform_indices = @transform_2, window_bounds = array<i64: 1, 512>}, {pipeline_mode = #tpu.pipeline_mode<synchronous>, transform_indices = @transform_3, window_bounds = array<i64: 1, 512>}, {pipeline_mode = #tpu.pipeline_mode<synchronous>, transform_indices = @transform_4, window_bounds = array<i64: 1, 512>}, {pipeline_mode = #tpu.pipeline_mode<synchronous>, transform_indices = @transform_5, window_bounds = array<i64: 512, 256>}, {pipeline_mode = #tpu.pipeline_mode<synchronous>, transform_indices = @transform_6, window_bounds = array<i64: 1, 256>}, {pipeline_mode = #tpu.pipeline_mode<synchronous>, transform_indices = @transform_7, window_bounds = array<i64: 1, 256>}, {pipeline_mode = #tpu.pipeline_mode<synchronous>, transform_indices = @transform_8, window_bounds = array<i64: 1, 256>}, {pipeline_mode = #tpu.pipeline_mode<synchronous>, transform_indices = @transform_9, window_bounds = array<i64: 256, 128>}, {pipeline_mode = #tpu.pipeline_mode<synchronous>, transform_indices = @transform_10, window_bounds = array<i64: 1, 128>}, {transform_indices = @transform_11, window_bounds = array<i64: 16, 128>}]} {
    %c0 = arith.constant 0 : index
    %c0_0 = arith.constant 0 : index
    %0 = vector.load %arg1[%c0, %c0_0] : memref<16x768xf32, #tpu.memory_space<vmem>>, vector<16x768xf32>
    %1 = arith.truncf %0 : vector<16x768xf32> to vector<16x768xbf16>
    %c0_1 = arith.constant 0 : index
    %c0_2 = arith.constant 0 : index
    %2 = vector.load %arg2[%c0_1, %c0_2] : memref<768x512xbf16, #tpu.memory_space<vmem>>, vector<768x512xbf16>
    %cst = arith.constant dense<0.000000e+00> : vector<16x512xf32>
    %3 = tpu.matmul %1, %2, %cst {dimension_numbers = #tpu.dot_dimension_numbers<[1], [0], [0], [1], [0, 0, 1, 1], [], []>} : vector<16x768xbf16>, vector<768x512xbf16>, vector<16x512xf32> -> vector<16x512xf32>
    %c0_3 = arith.constant 0 : index
    %c0_4 = arith.constant 0 : index
    %4 = vector.load %arg3[%c0_3, %c0_4] : memref<1x512xf32, #tpu.memory_space<vmem>>, vector<1x512xf32>
    %5 = vector.broadcast %4 : vector<1x512xf32> to vector<16x512xf32>
    %6 = arith.addf %3, %5 : vector<16x512xf32>
    %c0_5 = arith.constant 0 : index
    %c0_6 = arith.constant 0 : index
    %7 = vector.load %arg4[%c0_5, %c0_6] : memref<1x512xf32, #tpu.memory_space<vmem>>, vector<1x512xf32>
    %c0_7 = arith.constant 0 : index
    %c0_8 = arith.constant 0 : index
    %8 = vector.load %arg5[%c0_7, %c0_8] : memref<1x512xf32, #tpu.memory_space<vmem>>, vector<1x512xf32>
    %cst_9 = arith.constant dense<0.000000e+00> : vector<16xf32>
    %9 = vector.multi_reduction <add>, %6, %cst_9 [1] : vector<16x512xf32> to vector<16xf32>
    %10 = vector.shape_cast %9 : vector<16xf32> to vector<16x1xf32>
    %cst_10 = arith.constant 5.120000e+02 : f32
    %11 = vector.broadcast %cst_10 : f32 to vector<16x1xf32>
    %12 = arith.divf %10, %11 : vector<16x1xf32>
    %13 = arith.mulf %6, %6 : vector<16x512xf32>
    %cst_11 = arith.constant dense<0.000000e+00> : vector<16xf32>
    %14 = vector.multi_reduction <add>, %13, %cst_11 [1] : vector<16x512xf32> to vector<16xf32>
    %15 = vector.shape_cast %14 : vector<16xf32> to vector<16x1xf32>
    %cst_12 = arith.constant 5.120000e+02 : f32
    %16 = vector.broadcast %cst_12 : f32 to vector<16x1xf32>
    %17 = arith.divf %15, %16 : vector<16x1xf32>
    %18 = arith.mulf %12, %12 : vector<16x1xf32>
    %19 = arith.subf %17, %18 : vector<16x1xf32>
    %cst_13 = arith.constant 0.000000e+00 : f32
    %20 = vector.broadcast %cst_13 : f32 to vector<16x1xf32>
    %21 = arith.maximumf %19, %20 : vector<16x1xf32>
    %22 = vector.broadcast %12 : vector<16x1xf32> to vector<16x512xf32>
    %23 = arith.subf %6, %22 : vector<16x512xf32>
    %cst_14 = arith.constant 9.99999974E-6 : f32
    %24 = vector.broadcast %cst_14 : f32 to vector<16x1xf32>
    %25 = arith.addf %21, %24 : vector<16x1xf32>
    %26 = math.rsqrt %25 : vector<16x1xf32>
    %27 = vector.broadcast %26 : vector<16x1xf32> to vector<16x512xf32>
    %28 = arith.mulf %23, %27 : vector<16x512xf32>
    %29 = vector.broadcast %7 : vector<1x512xf32> to vector<16x512xf32>
    %30 = arith.mulf %28, %29 : vector<16x512xf32>
    %31 = vector.broadcast %8 : vector<1x512xf32> to vector<16x512xf32>
    %32 = arith.addf %30, %31 : vector<16x512xf32>
    %cst_15 = arith.constant 0.000000e+00 : f32
    %33 = vector.broadcast %cst_15 : f32 to vector<16x512xf32>
    %34 = arith.cmpf ogt, %32, %33 : vector<16x512xf32>
    %cst_16 = arith.constant 0.00999999977 : f32
    %35 = vector.broadcast %cst_16 : f32 to vector<16x512xf32>
    %36 = arith.mulf %35, %32 : vector<16x512xf32>
    %37 = arith.select %34, %32, %36 : vector<16x512xi1>, vector<16x512xf32>
    %38 = arith.truncf %37 : vector<16x512xf32> to vector<16x512xbf16>
    %c0_17 = arith.constant 0 : index
    %c0_18 = arith.constant 0 : index
    %39 = vector.load %arg6[%c0_17, %c0_18] : memref<512x256xbf16, #tpu.memory_space<vmem>>, vector<512x256xbf16>
    %cst_19 = arith.constant dense<0.000000e+00> : vector<16x256xf32>
    %40 = tpu.matmul %38, %39, %cst_19 {dimension_numbers = #tpu.dot_dimension_numbers<[1], [0], [0], [1], [0, 0, 1, 1], [], []>} : vector<16x512xbf16>, vector<512x256xbf16>, vector<16x256xf32> -> vector<16x256xf32>
    %c0_20 = arith.constant 0 : index
    %c0_21 = arith.constant 0 : index
    %41 = vector.load %arg7[%c0_20, %c0_21] : memref<1x256xf32, #tpu.memory_space<vmem>>, vector<1x256xf32>
    %42 = vector.broadcast %41 : vector<1x256xf32> to vector<16x256xf32>
    %43 = arith.addf %40, %42 : vector<16x256xf32>
    %c0_22 = arith.constant 0 : index
    %c0_23 = arith.constant 0 : index
    %44 = vector.load %arg8[%c0_22, %c0_23] : memref<1x256xf32, #tpu.memory_space<vmem>>, vector<1x256xf32>
    %c0_24 = arith.constant 0 : index
    %c0_25 = arith.constant 0 : index
    %45 = vector.load %arg9[%c0_24, %c0_25] : memref<1x256xf32, #tpu.memory_space<vmem>>, vector<1x256xf32>
    %cst_26 = arith.constant dense<0.000000e+00> : vector<16xf32>
    %46 = vector.multi_reduction <add>, %43, %cst_26 [1] : vector<16x256xf32> to vector<16xf32>
    %47 = vector.shape_cast %46 : vector<16xf32> to vector<16x1xf32>
    %cst_27 = arith.constant 2.560000e+02 : f32
    %48 = vector.broadcast %cst_27 : f32 to vector<16x1xf32>
    %49 = arith.divf %47, %48 : vector<16x1xf32>
    %50 = arith.mulf %43, %43 : vector<16x256xf32>
    %cst_28 = arith.constant dense<0.000000e+00> : vector<16xf32>
    %51 = vector.multi_reduction <add>, %50, %cst_28 [1] : vector<16x256xf32> to vector<16xf32>
    %52 = vector.shape_cast %51 : vector<16xf32> to vector<16x1xf32>
    %cst_29 = arith.constant 2.560000e+02 : f32
    %53 = vector.broadcast %cst_29 : f32 to vector<16x1xf32>
    %54 = arith.divf %52, %53 : vector<16x1xf32>
    %55 = arith.mulf %49, %49 : vector<16x1xf32>
    %56 = arith.subf %54, %55 : vector<16x1xf32>
    %cst_30 = arith.constant 0.000000e+00 : f32
    %57 = vector.broadcast %cst_30 : f32 to vector<16x1xf32>
    %58 = arith.maximumf %56, %57 : vector<16x1xf32>
    %59 = vector.broadcast %49 : vector<16x1xf32> to vector<16x256xf32>
    %60 = arith.subf %43, %59 : vector<16x256xf32>
    %cst_31 = arith.constant 9.99999974E-6 : f32
    %61 = vector.broadcast %cst_31 : f32 to vector<16x1xf32>
    %62 = arith.addf %58, %61 : vector<16x1xf32>
    %63 = math.rsqrt %62 : vector<16x1xf32>
    %64 = vector.broadcast %63 : vector<16x1xf32> to vector<16x256xf32>
    %65 = arith.mulf %60, %64 : vector<16x256xf32>
    %66 = vector.broadcast %44 : vector<1x256xf32> to vector<16x256xf32>
    %67 = arith.mulf %65, %66 : vector<16x256xf32>
    %68 = vector.broadcast %45 : vector<1x256xf32> to vector<16x256xf32>
    %69 = arith.addf %67, %68 : vector<16x256xf32>
    %cst_32 = arith.constant 0.000000e+00 : f32
    %70 = vector.broadcast %cst_32 : f32 to vector<16x256xf32>
    %71 = arith.cmpf ogt, %69, %70 : vector<16x256xf32>
    %cst_33 = arith.constant 0.00999999977 : f32
    %72 = vector.broadcast %cst_33 : f32 to vector<16x256xf32>
    %73 = arith.mulf %72, %69 : vector<16x256xf32>
    %74 = arith.select %71, %69, %73 : vector<16x256xi1>, vector<16x256xf32>
    %75 = arith.truncf %74 : vector<16x256xf32> to vector<16x256xbf16>
    %c0_34 = arith.constant 0 : index
    %c0_35 = arith.constant 0 : index
    %76 = vector.load %arg10[%c0_34, %c0_35] : memref<256x128xbf16, #tpu.memory_space<vmem>>, vector<256x128xbf16>
    %cst_36 = arith.constant dense<0.000000e+00> : vector<16x128xf32>
    %77 = tpu.matmul %75, %76, %cst_36 {dimension_numbers = #tpu.dot_dimension_numbers<[1], [0], [0], [1], [0, 0, 1, 1], [], []>} : vector<16x256xbf16>, vector<256x128xbf16>, vector<16x128xf32> -> vector<16x128xf32>
    %c0_37 = arith.constant 0 : index
    %c0_38 = arith.constant 0 : index
    %78 = vector.load %arg11[%c0_37, %c0_38] : memref<1x128xf32, #tpu.memory_space<vmem>>, vector<1x128xf32>
    %79 = vector.broadcast %78 : vector<1x128xf32> to vector<16x128xf32>
    %80 = arith.addf %77, %79 : vector<16x128xf32>
    %c0_39 = arith.constant 0 : index
    %c0_40 = arith.constant 0 : index
    %81 = vector.load %arg12[%c0_39, %c0_40] : memref<16x128xf32, #tpu.memory_space<vmem>>, vector<16x128xf32>
    tpu.vector_store %arg12[%c0_39, %c0_40], %80 {strides = array<i32>} : memref<16x128xf32, #tpu.memory_space<vmem>>, vector<16x128xf32>,
    return
  }
  func.func @transform_0(%arg0: i32) -> (i32, i32) {
    %c0_i32 = arith.constant 0 : i32
    %c0_i32_0 = arith.constant 0 : i32
    return %arg0, %c0_i32 : i32, i32
  }
  func.func @transform_1(%arg0: i32) -> (i32, i32) {
    %c0_i32 = arith.constant 0 : i32
    %c0_i32_0 = arith.constant 0 : i32
    %c0_i32_1 = arith.constant 0 : i32
    return %c0_i32, %c0_i32_0 : i32, i32
  }
  func.func @transform_2(%arg0: i32) -> (i32, i32) {
    %c0_i32 = arith.constant 0 : i32
    %c0_i32_0 = arith.constant 0 : i32
    %c0_i32_1 = arith.constant 0 : i32
    return %c0_i32, %c0_i32_0 : i32, i32
  }
  func.func @transform_3(%arg0: i32) -> (i32, i32) {
    %c0_i32 = arith.constant 0 : i32
    %c0_i32_0 = arith.constant 0 : i32
    %c0_i32_1 = arith.constant 0 : i32
    return %c0_i32, %c0_i32_0 : i32, i32
  }
  func.func @transform_4(%arg0: i32) -> (i32, i32) {
    %c0_i32 = arith.constant 0 : i32
    %c0_i32_0 = arith.constant 0 : i32
    %c0_i32_1 = arith.constant 0 : i32
    return %c0_i32, %c0_i32_0 : i32, i32
  }
  func.func @transform_5(%arg0: i32) -> (i32, i32) {
    %c0_i32 = arith.constant 0 : i32
    %c0_i32_0 = arith.constant 0 : i32
    %c0_i32_1 = arith.constant 0 : i32
    return %c0_i32, %c0_i32_0 : i32, i32
  }
  func.func @transform_6(%arg0: i32) -> (i32, i32) {
    %c0_i32 = arith.constant 0 : i32
    %c0_i32_0 = arith.constant 0 : i32
    %c0_i32_1 = arith.constant 0 : i32
    return %c0_i32, %c0_i32_0 : i32, i32
  }
  func.func @transform_7(%arg0: i32) -> (i32, i32) {
    %c0_i32 = arith.constant 0 : i32
    %c0_i32_0 = arith.constant 0 : i32
    %c0_i32_1 = arith.constant 0 : i32
    return %c0_i32, %c0_i32_0 : i32, i32
  }
  func.func @transform_8(%arg0: i32) -> (i32, i32) {
    %c0_i32 = arith.constant 0 : i32
    %c0_i32_0 = arith.constant 0 : i32
    %c0_i32_1 = arith.constant 0 : i32
    return %c0_i32, %c0_i32_0 : i32, i32
  }
  func.func @transform_9(%arg0: i32) -> (i32, i32) {
    %c0_i32 = arith.constant 0 : i32
    %c0_i32_0 = arith.constant 0 : i32
    %c0_i32_1 = arith.constant 0 : i32
    return %c0_i32, %c0_i32_0 : i32, i32
  }
  func.func @transform_10(%arg0: i32) -> (i32, i32) {
    %c0_i32 = arith.constant 0 : i32
    %c0_i32_0 = arith.constant 0 : i32
    %c0_i32_1 = arith.constant 0 : i32
    return %c0_i32, %c0_i32_0 : i32, i32
  }
  func.func @transform_11(%arg0: i32) -> (i32, i32) {
    %c0_i32 = arith.constant 0 : i32
    %c0_i32_0 = arith.constant 0 : i32
    return %arg0, %c0_i32 : i32, i32
  }
}

</mosaic_0001>

<bundles_post_ra>
// kernel: tpu_custom_call.1
= control target key start
LH: loop header
LB: loop body
LE: loop exit
PB: predicated region body
PF: predicated region fallthrough
CT: control target
= control target key end

     0   :  { %16 = vsyncpa [#allocation3], 0  ;;  %s3611_s0 = inlined_call_operand.hbm [shape: f32[16,768], index: 0, kind: input, shape index: {}]   ;;  %s3612_s1 = inlined_call_operand.hbm [shape: bf16[768,512], index: 1, kind: input, shape index: {}]   ;;  %s3613_s2 = inlined_call_operand.vmem [shape: f32[1,512], index: 2, kind: input, shape index: {}]   ;;  %s3614_s3 = inlined_call_operand.vmem [shape: f32[1,512], index: 3, kind: input, shape index: {}]   ;;  %s3615_s4 = inlined_call_operand.vmem [shape: f32[1,512], index: 4, kind: input, shape index: {}]   ;;  %s3616_s5 = inlined_call_operand.hbm [shape: bf16[512,256], index: 5, kind: input, shape index: {}]   ;;  %s3617_s6 = inlined_call_operand.vmem [shape: f32[1,256], index: 6, kind: input, shape index: {}]   ;;  %s3618_s7 = inlined_call_operand.vmem [shape: f32[1,256], index: 7, kind: input, shape index: {}]   ;;  %s3619_s8 = inlined_call_operand.vmem [shape: f32[1,256], index: 8, kind: input, shape index: {}]   ;;  %s3620_s9 = inlined_call_operand.hbm [shape: bf16[256,128], index: 9, kind: input, shape index: {}]   ;;  %s3621_s10 = inlined_call_operand.vmem [shape: f32[1,128], index: 10, kind: input, shape index: {}]   ;;  %s3622_s11 = inlined_call_operand.hbm [shape: f32[16,128], index: 11, kind: output, shape index: {}]  }
   0x1   :  { %17 = vsyncpa [#allocation6], 0 }
   0x2   :  { %18 = vsyncpa [#allocation9], 0 }
   0x3   :  { %19 = vsyncpa [#allocation4], 0  ;;  %s3322_s17 = smov [#allocation5]   ;;  %s3204_s21 = scalar_lea.hbm %s3612_s1, 24576 }
   0x4   :  { %s37_s18 = sshll.u32 %s3322_s17, 4  ;;  %p3205_p0 = scmp.ne.s32.totalorder %s3612_s1, %s3204_s21  ;;  %s38_s18 = int_to_ptr.vmem [resolvable:$true] %s37_s18 }
   0x5   :  { %p3208_p1 = scmp.lt.u32.totalorder %s3204_s21, %s3612_s1 }
   0x7   :  { %p3210_p2 = pnand %p3208_p1, %p3205_p0 }
   0x9   :  { %3213 = shalt.err (!%p3210_p2)
}
   0xa   :  { %s3214_s26 = scalar_lea.vmem %s38_s18, 24576  ;;  %p3219_p4 = scmp.lt.s32.totalorder %s38_s18, %s38_s18 }
   0xb   :  { %p3215_p3 = scmp.ne.s32.totalorder %s38_s18, %s3214_s26  ;;  %p3220_p5 = scmp.lt.s32.totalorder %s3214_s26, %s3214_s26 }
   0xd   :  { %p3221_p6 = por %p3220_p5, %p3219_p4 }
   0xf   :  { %p3222_p7 = pnand %p3221_p6, %p3215_p3 }
  0x11   :  { %3225 = shalt.err (!%p3222_p7)
}
  0x12   :  { %s3323_s27 = smov 256   ;;  %s3324_s28 = smov 16  }
  0x13   :  { %43 = dma.hbm_to_vmem [thread:$0]  %s3612_s1, 24576, %s38_s18, [#allocation6], %s3323_s27, %s3323_s27, %s3324_s28  }
  0x14   :  { %s3325_s12 = smov [#allocation2]   ;;  %s3226_s16 = scalar_lea.hbm %s3611_s0, 1536 }
  0x15   :  { %s25_s13 = sshll.u32 %s3325_s12, 4  ;;  %p3227_p8 = scmp.ne.s32.totalorder %s3611_s0, %s3226_s16  ;;  %s26_s13 = int_to_ptr.vmem [resolvable:$true] %s25_s13 }
  0x16   :  { %p3230_p9 = scmp.lt.u32.totalorder %s3226_s16, %s3611_s0 }
  0x18   :  { %p3232_p10 = pnand %p3230_p9, %p3227_p8 }
  0x1a   :  { %3235 = shalt.err (!%p3232_p10)
}
  0x1b   :  { %s3236_s22 = scalar_lea.vmem %s26_s13, 1536  ;;  %p3241_p12 = scmp.lt.s32.totalorder %s26_s13, %s26_s13 }
  0x1c   :  { %p3237_p11 = scmp.ne.s32.totalorder %s26_s13, %s3236_s22  ;;  %p3242_p13 = scmp.lt.s32.totalorder %s3236_s22, %s3236_s22 }
  0x1e   :  { %p3243_p0 = por %p3242_p13, %p3241_p12 }
  0x20   :  { %p3244_p1 = pnand %p3243_p0, %p3237_p11 }
  0x22   :  { %3247 = shalt.err (!%p3244_p1)
}
  0x23   :  { %s3326_s1 = smov 768   ;;  %s3327_s18 = smov 48  }
  0x24   :  { %31 = dma.hbm_to_vmem [thread:$0]  %s3611_s0, 1536, %s26_s13, [#allocation3], %s3326_s1, %s3326_s1, %s3327_s18  }
  0x25   :  { %s3328_s25 = smov [#allocation7]   ;;  %s3248_s29 = scalar_lea.hbm %s3616_s5, 8192 }
  0x26   :  { %s55_s26 = sshll.u32 %s3328_s25, 4  ;;  %p3249_p2 = scmp.ne.s32.totalorder %s3616_s5, %s3248_s29  ;;  %s56_s26 = int_to_ptr.vmem [resolvable:$true] %s55_s26 }
  0x27   :  { %p3252_p3 = scmp.lt.u32.totalorder %s3248_s29, %s3616_s5 }
  0x29   :  { %p3254_p4 = pnand %p3252_p3, %p3249_p2 }
  0x2b   :  { %3257 = shalt.err (!%p3254_p4)
}
  0x2c   :  { %s3258_s16 = scalar_lea.vmem %s56_s26, 8192  ;;  %p3263_p6 = scmp.lt.s32.totalorder %s56_s26, %s56_s26 }
  0x2d   :  { %p3259_p5 = scmp.ne.s32.totalorder %s56_s26, %s3258_s16  ;;  %p3264_p7 = scmp.lt.s32.totalorder %s3258_s16, %s3258_s16 }
  0x2f   :  { %p3265_p8 = por %p3264_p7, %p3263_p6 }
  0x31   :  { %p3266_p9 = pnand %p3265_p8, %p3259_p5 }
  0x33   :  { %3269 = shalt.err (!%p3266_p9)
}
  0x34   :  { %s3329_s0 = smov 128   ;;  %s3330_s13 = smov 8  }
  0x35   :  { %61 = dma.hbm_to_vmem [thread:$0]  %s3616_s5, 8192, %s56_s26, [#allocation6], %s3329_s0, %s3329_s0, %s3330_s13  }
  0x36   :  { %s3331_s20 = smov [#allocation8]   ;;  %s3270_s18 = scalar_lea.hbm %s3620_s9, 2048 }
  0x37   :  { %s73_s21 = sshll.u32 %s3331_s20, 4  ;;  %p3271_p10 = scmp.ne.s32.totalorder %s3620_s9, %s3270_s18  ;;  %s74_s21 = int_to_ptr.vmem [resolvable:$true] %s73_s21 }
  0x38   :  { %p3274_p11 = scmp.lt.u32.totalorder %s3270_s18, %s3620_s9 }
  0x3a   :  { %p3276_p12 = pnand %p3274_p11, %p3271_p10 }
  0x3c   :  { %3279 = shalt.err (!%p3276_p12)
}
  0x3d   :  { %s3280_s28 = scalar_lea.vmem %s74_s21, 2048  ;;  %p3285_p0 = scmp.lt.s32.totalorder %s74_s21, %s74_s21 }
  0x3e   :  { %p3281_p13 = scmp.ne.s32.totalorder %s74_s21, %s3280_s28  ;;  %p3286_p1 = scmp.lt.s32.totalorder %s3280_s28, %s3280_s28 }
  0x40   :  { %p3287_p2 = por %p3286_p1, %p3285_p0 }
  0x42   :  { %p3288_p3 = pnand %p3287_p2, %p3281_p13 }
  0x44   :  { %3291 = shalt.err (!%p3288_p3)
}
  0x45   :  { %s3332_s5 = smov 64   ;;  %s3333_s26 = smov 4  }
  0x46   :  { %79 = dma.hbm_to_vmem [thread:$0]  %s3620_s9, 2048, %s74_s21, [#allocation9], %s3332_s5, %s3332_s5, %s3333_s26  }
  0x47   :  { %3314 = dma.done.wait [#allocation3], 1536  }
  0x48   :  { %3315 = vsyncadd [#allocation3], 4294965760 }
  0x49   :  { %3316 = dma.done.wait [#allocation6], 32768  }
  0x4a   :  { %3317 = vsyncadd [#allocation6], 4294934528 }
  0x4b   :  { %3318 = dma.done.wait [#allocation9], 2048  }
  0x4c   :  { %3319 = vsyncadd [#allocation9], 4294965248  ;;  %v2796_v0 = vld [vmem:[#allocation5 + $0x4] ss:$16 sps:$4 sm:$0xff]   ;;  %v2800_v2 = vld [vmem:[#allocation5] ss:$16 sps:$4 sm:$0xff]  }
  0x4d   :  { %v2798_v1 = vld [vmem:[#allocation5 + $0x204] ss:$16 sps:$4 sm:$0xff]   ;;  %1287 = vmatprep.subr.bf16.mxu1 %v2796_v0  ;;  %v2801_v3 = vld [vmem:[#allocation5 + $0x200] ss:$16 sps:$4 sm:$0xff]   ;;  %v96_v46 = vld [vmem:[#allocation2 + $0x8] sm:$0xff]  ;;  %s3334_s21 = smov [#allocation10]  }
  0x4e   :  { %1330 = vmatprep.subr.bf16.mxu0 %v2798_v1  ;;  %v2802_v4 = vld [vmem:[#allocation5 + $0x24] ss:$16 sps:$4 sm:$0xff]   ;;  %1288 = vmatpush1.bf16.msra.mxu1 %v2800_v2  ;;  %v2806_v6 = vld [vmem:[#allocation5 + $0x20] ss:$16 sps:$4 sm:$0xff]   ;;  %v102_v49 = vld [vmem:[#allocation2 + $0x38] sm:$0xff]  ;;  %s2442_s22 = sshll.u32 %s3334_s21, 4  ;;  %s2443_s22 = int_to_ptr.vmem [resolvable:$true] %s2442_s22 }
  0x4f   :  { %1331 = vmatpush1.bf16.msra.mxu0 %v2801_v3  ;;  %v2804_v5 = vld [vmem:[#allocation5 + $0x224] ss:$16 sps:$4 sm:$0xff]   ;;  %1289 = vmatprep.subr.bf16.mxu1 %v2802_v4  ;;  %v2807_v7 = vld [vmem:[#allocation5 + $0x220] ss:$16 sps:$4 sm:$0xff]   ;;  %v3446_v50 = vpack.c.bf16 %v102_v49, %v96_v46  ;;  %v98_v51 = vld [vmem:[#allocation2 + $0x18] sm:$0xff]  ;;  %s3292_s1 = scalar_lea.vmem %s2443_s22, 256  ;;  %p3297_p5 = scmp.lt.s32.totalorder %s2443_s22, %s2443_s22 }
  0x50   :  { %1332 = vmatprep.subr.bf16.mxu0 %v2804_v5  ;;  %v2808_v8 = vld [vmem:[#allocation5 + $0x44] ss:$16 sps:$4 sm:$0xff]   ;;  %v2812_v10 = vld [vmem:[#allocation5 + $0x40] ss:$16 sps:$4 sm:$0xff]   ;;  %v104_v52 = vld [vmem:[#allocation2 + $0x48] sm:$0xff]  ;;  %p3293_p4 = scmp.ne.s32.totalorder %s2443_s22, %s3292_s1  ;;  %p3298_p6 = scmp.lt.s32.totalorder %s3292_s1, %s3292_s1 }
  0x51   :  { %v2810_v9 = vld [vmem:[#allocation5 + $0x244] ss:$16 sps:$4 sm:$0xff]   ;;  %v2813_v11 = vld [vmem:[#allocation5 + $0x240] ss:$16 sps:$4 sm:$0xff]   ;;  %v3448_v55 = vpack.c.bf16 %v104_v52, %v98_v51  ;;  %1319 = vmatprep.mubr.bf16.mxu1 %v3446_v50  ;;  %v2937_v46 = vld [vmem:[#allocation5 + $0xe8] ss:$16 sps:$4 sm:$0xff]  }
  0x52   :  { %1290 = vmatpush1.bf16.msra.mxu1 %v2806_v6  ;;  %v2814_v12 = vld [vmem:[#allocation5 + $0x64] ss:$16 sps:$4 sm:$0xff]   ;;  %v2818_v14 = vld [vmem:[#allocation5 + $0x60] ss:$16 sps:$4 sm:$0xff]   ;;  %v2951_v52 = vld [vmem:[#allocation5 + $0x12c] ss:$16 sps:$4 sm:$0xff]   ;;  %p3299_p7 = por %p3298_p6, %p3297_p5 }
  0x53   :  { %1333 = vmatpush1.bf16.msra.mxu0 %v2807_v7  ;;  %1291 = vmatprep.subr.bf16.mxu1 %v2808_v8  ;;  %v2816_v13 = vld [vmem:[#allocation5 + $0x264] ss:$16 sps:$4 sm:$0xff]   ;;  %v2819_v15 = vld [vmem:[#allocation5 + $0x260] ss:$16 sps:$4 sm:$0xff]  }
  0x54   :  { %1334 = vmatprep.subr.bf16.mxu0 %v2810_v9  ;;  %v2820_v16 = vld [vmem:[#allocation5 + $0x84] ss:$16 sps:$4 sm:$0xff]   ;;  %v2824_v18 = vld [vmem:[#allocation5 + $0x80] ss:$16 sps:$4 sm:$0xff]   ;;  %1362 = vmatprep.mubr.bf16.mxu0 %v3448_v55  ;;  %p3300_p8 = pnand %p3299_p7, %p3293_p4 }
  0x55   :  { %v2822_v17 = vld [vmem:[#allocation5 + $0x284] ss:$16 sps:$4 sm:$0xff]   ;;  %v2825_v19 = vld [vmem:[#allocation5 + $0x280] ss:$16 sps:$4 sm:$0xff]  }
  0x56   :  { %1292 = vmatpush1.bf16.msra.mxu1 %v2812_v10  ;;  %v2826_v20 = vld [vmem:[#allocation5 + $0xa4] ss:$16 sps:$4 sm:$0xff]   ;;  %v2830_v22 = vld [vmem:[#allocation5 + $0xa0] ss:$16 sps:$4 sm:$0xff]  }
  0x57   :  { %1335 = vmatpush1.bf16.msra.mxu0 %v2813_v11  ;;  %1293 = vmatprep.subr.bf16.mxu1 %v2814_v12  ;;  %v2828_v21 = vld [vmem:[#allocation5 + $0x2a4] ss:$16 sps:$4 sm:$0xff]   ;;  %v2831_v23 = vld [vmem:[#allocation5 + $0x2a0] ss:$16 sps:$4 sm:$0xff]   ;;  %v2897_v11 = vld [vmem:[#allocation5 + $0xc] ss:$16 sps:$4 sm:$0xff]  }
  0x58   :  { %1336 = vmatprep.subr.bf16.mxu0 %v2816_v13  ;;  %v2832_v24 = vld [vmem:[#allocation5 + $0xc4] ss:$16 sps:$4 sm:$0xff]   ;;  %v2836_v26 = vld [vmem:[#allocation5 + $0xc0] ss:$16 sps:$4 sm:$0xff]  }
  0x59   :  { %v2834_v25 = vld [vmem:[#allocation5 + $0x2c4] ss:$16 sps:$4 sm:$0xff]   ;;  %v2837_v27 = vld [vmem:[#allocation5 + $0x2c0] ss:$16 sps:$4 sm:$0xff]  }
  0x5a   :  { %1294 = vmatpush1.bf16.msra.mxu1 %v2818_v14  ;;  %v2838_v28 = vld [vmem:[#allocation5 + $0xe4] ss:$16 sps:$4 sm:$0xff]   ;;  %v2842_v30 = vld [vmem:[#allocation5 + $0xe0] ss:$16 sps:$4 sm:$0xff]   ;;  %v2895_v14 = vld [vmem:[#allocation5 + $0x8] ss:$16 sps:$4 sm:$0xff]  }
  0x5b   :  { %1337 = vmatpush1.bf16.msra.mxu0 %v2819_v15  ;;  %1295 = vmatprep.subr.bf16.mxu1 %v2820_v16  ;;  %v2840_v29 = vld [vmem:[#allocation5 + $0x2e4] ss:$16 sps:$4 sm:$0xff]   ;;  %v2843_v31 = vld [vmem:[#allocation5 + $0x2e0] ss:$16 sps:$4 sm:$0xff]  }
  0x5c   :  { %1338 = vmatprep.subr.bf16.mxu0 %v2822_v17  ;;  %v2844_v32 = vld [vmem:[#allocation5 + $0x104] ss:$16 sps:$4 sm:$0xff]   ;;  %v2848_v34 = vld [vmem:[#allocation5 + $0x100] ss:$16 sps:$4 sm:$0xff]   ;;  %v2903_v17 = vld [vmem:[#allocation5 + $0x2c] ss:$16 sps:$4 sm:$0xff]  }
  0x5d   :  { %v2846_v33 = vld [vmem:[#allocation5 + $0x304] ss:$16 sps:$4 sm:$0xff]   ;;  %v2849_v35 = vld [vmem:[#allocation5 + $0x300] ss:$16 sps:$4 sm:$0xff]  }
  0x5e   :  { %1296 = vmatpush1.bf16.msra.mxu1 %v2824_v18  ;;  %v2850_v36 = vld [vmem:[#allocation5 + $0x124] ss:$16 sps:$4 sm:$0xff]   ;;  %v2854_v38 = vld [vmem:[#allocation5 + $0x120] ss:$16 sps:$4 sm:$0xff]  }
  0x5f   :  { %1339 = vmatpush1.bf16.msra.mxu0 %v2825_v19  ;;  %1297 = vmatprep.subr.bf16.mxu1 %v2826_v20  ;;  %v2852_v37 = vld [vmem:[#allocation5 + $0x324] ss:$16 sps:$4 sm:$0xff]   ;;  %v2855_v39 = vld [vmem:[#allocation5 + $0x320] ss:$16 sps:$4 sm:$0xff]   ;;  %v2901_v19 = vld [vmem:[#allocation5 + $0x28] ss:$16 sps:$4 sm:$0xff]  }
  0x60   :  { %1340 = vmatprep.subr.bf16.mxu0 %v2828_v21  ;;  %v2856_v40 = vld [vmem:[#allocation5 + $0x144] ss:$16 sps:$4 sm:$0xff]   ;;  %v2860_v42 = vld [vmem:[#allocation5 + $0x140] ss:$16 sps:$4 sm:$0xff]   ;;  %v2909_v21 = vld [vmem:[#allocation5 + $0x4c] ss:$16 sps:$4 sm:$0xff]  }
  0x61   :  { %v2858_v41 = vld [vmem:[#allocation5 + $0x344] ss:$16 sps:$4 sm:$0xff]   ;;  %v2861_v43 = vld [vmem:[#allocation5 + $0x340] ss:$16 sps:$4 sm:$0xff]  }
  0x62   :  { %1298 = vmatpush1.bf16.msra.mxu1 %v2830_v22  ;;  %v2862_v44 = vld [vmem:[#allocation5 + $0x164] ss:$16 sps:$4 sm:$0xff]   ;;  %v2866_v47 = vld [vmem:[#allocation5 + $0x160] ss:$16 sps:$4 sm:$0xff]  }
  0x63   :  { %1341 = vmatpush1.bf16.msra.mxu0 %v2831_v23  ;;  %1299 = vmatprep.subr.bf16.mxu1 %v2832_v24  ;;  %v2864_v45 = vld [vmem:[#allocation5 + $0x364] ss:$16 sps:$4 sm:$0xff]   ;;  %v2867_v48 = vld [vmem:[#allocation5 + $0x360] ss:$16 sps:$4 sm:$0xff]   ;;  %v2907_v23 = vld [vmem:[#allocation5 + $0x48] ss:$16 sps:$4 sm:$0xff]  }
  0x64   :  { %1342 = vmatprep.subr.bf16.mxu0 %v2834_v25  ;;  %v2868_v53 = vld [vmem:[#allocation5 + $0x184] ss:$16 sps:$4 sm:$0xff]   ;;  %v2872_v56 = vld [vmem:[#allocation5 + $0x180] ss:$16 sps:$4 sm:$0xff]   ;;  %v2915_v25 = vld [vmem:[#allocation5 + $0x6c] ss:$16 sps:$4 sm:$0xff]  }
  0x65   :  { %v2870_v54 = vld [vmem:[#allocation5 + $0x384] ss:$16 sps:$4 sm:$0xff]   ;;  %v2873_v57 = vld [vmem:[#allocation5 + $0x380] ss:$16 sps:$4 sm:$0xff]  }
  0x66   :  { %1300 = vmatpush1.bf16.msra.mxu1 %v2836_v26  ;;  %v2874_v58 = vld [vmem:[#allocation5 + $0x1a4] ss:$16 sps:$4 sm:$0xff]   ;;  %v2878_v60 = vld [vmem:[#allocation5 + $0x1a0] ss:$16 sps:$4 sm:$0xff]  }
  0x67   :  { %1343 = vmatpush1.bf16.msra.mxu0 %v2837_v27  ;;  %1301 = vmatprep.subr.bf16.mxu1 %v2838_v28  ;;  %v2876_v59 = vld [vmem:[#allocation5 + $0x3a4] ss:$16 sps:$4 sm:$0xff]   ;;  %v2879_v61 = vld [vmem:[#allocation5 + $0x3a0] ss:$16 sps:$4 sm:$0xff]   ;;  %v2913_v27 = vld [vmem:[#allocation5 + $0x68] ss:$16 sps:$4 sm:$0xff]  }
  0x68   :  { %1344 = vmatprep.subr.bf16.mxu0 %v2840_v29  ;;  %v2880_v62 = vld [vmem:[#allocation5 + $0x1c4] ss:$16 sps:$4 sm:$0xff]   ;;  %v2884_v0 = vld [vmem:[#allocation5 + $0x1c0] ss:$16 sps:$4 sm:$0xff]   ;;  %v2921_v29 = vld [vmem:[#allocation5 + $0x8c] ss:$16 sps:$4 sm:$0xff]  }
  0x69   :  { %v2882_v63 = vld [vmem:[#allocation5 + $0x3c4] ss:$16 sps:$4 sm:$0xff]   ;;  %v2885_v1 = vld [vmem:[#allocation5 + $0x3c0] ss:$16 sps:$4 sm:$0xff]  }
  0x6a   :  { %1302 = vmatpush1.bf16.msra.mxu1 %v2842_v30  ;;  %v2886_v2 = vld [vmem:[#allocation5 + $0x1e4] ss:$16 sps:$4 sm:$0xff]   ;;  %v2890_v4 = vld [vmem:[#allocation5 + $0x1e0] ss:$16 sps:$4 sm:$0xff]  }
  0x6b   :  { %1345 = vmatpush1.bf16.msra.mxu0 %v2843_v31  ;;  %1303 = vmatprep.subr.bf16.mxu1 %v2844_v32  ;;  %v2888_v3 = vld [vmem:[#allocation5 + $0x3e4] ss:$16 sps:$4 sm:$0xff]   ;;  %v2891_v5 = vld [vmem:[#allocation5 + $0x3e0] ss:$16 sps:$4 sm:$0xff]   ;;  %v2919_v31 = vld [vmem:[#allocation5 + $0x88] ss:$16 sps:$4 sm:$0xff]  }
  0x6c   :  { %1346 = vmatprep.subr.bf16.mxu0 %v2846_v33  ;;  %v95_v6 = vld [vmem:[#allocation2] sm:$0xff]  ;;  %v101_v7 = vld [vmem:[#allocation2 + $0x30] sm:$0xff]  ;;  %v2927_v33 = vld [vmem:[#allocation5 + $0xac] ss:$16 sps:$4 sm:$0xff]  }
  0x6d   :  { %v2894_v8 = vld [vmem:[#allocation5 + $0x404] ss:$16 sps:$4 sm:$0xff]   ;;  %v3452_v12 = vpack.c.bf16 %v101_v7, %v95_v6  ;;  %v2892_v13 = vld [vmem:[#allocation5 + $0x400] ss:$16 sps:$4 sm:$0xff]   ;;  %v2973_v7 = vld [vmem:[#allocation5 + $0x1a8] ss:$16 sps:$4 sm:$0xff]  }
  0x6e   :  { %1304 = vmatpush1.bf16.msra.mxu1 %v2848_v34  ;;  %v97_v9 = vld [vmem:[#allocation2 + $0x10] sm:$0xff]  ;;  %v103_v10 = vld [vmem:[#allocation2 + $0x40] sm:$0xff] }
  0x6f   :  { %1347 = vmatpush1.bf16.msra.mxu0 %v2849_v35  ;;  %1305 = vmatprep.subr.bf16.mxu1 %v2850_v36  ;;  %v3454_v15 = vpack.c.bf16 %v103_v10, %v97_v9  ;;  %v2900_v16 = vld [vmem:[#allocation5 + $0x424] ss:$16 sps:$4 sm:$0xff]   ;;  %v2898_v18 = vld [vmem:[#allocation5 + $0x420] ss:$16 sps:$4 sm:$0xff]   ;;  %v2925_v35 = vld [vmem:[#allocation5 + $0xa8] ss:$16 sps:$4 sm:$0xff]  }
  0x70   :  { %1348 = vmatprep.subr.bf16.mxu0 %v2852_v37  ;;  %v2906_v20 = vld [vmem:[#allocation5 + $0x444] ss:$16 sps:$4 sm:$0xff]   ;;  %v2904_v22 = vld [vmem:[#allocation5 + $0x440] ss:$16 sps:$4 sm:$0xff]   ;;  %v2933_v37 = vld [vmem:[#allocation5 + $0xcc] ss:$16 sps:$4 sm:$0xff]  }
  0x71   :  { %v2912_v24 = vld [vmem:[#allocation5 + $0x464] ss:$16 sps:$4 sm:$0xff]   ;;  %v2910_v26 = vld [vmem:[#allocation5 + $0x460] ss:$16 sps:$4 sm:$0xff]   ;;  %v2981_v9 = vld [vmem:[#allocation5 + $0x1cc] ss:$16 sps:$4 sm:$0xff]  }
  0x72   :  { %1306 = vmatpush1.bf16.msra.mxu1 %v2854_v38  ;;  %v2918_v28 = vld [vmem:[#allocation5 + $0x484] ss:$16 sps:$4 sm:$0xff]   ;;  %v2916_v30 = vld [vmem:[#allocation5 + $0x480] ss:$16 sps:$4 sm:$0xff]  }
  0x73   :  { %1349 = vmatpush1.bf16.msra.mxu0 %v2855_v39  ;;  %1307 = vmatprep.subr.bf16.mxu1 %v2856_v40  ;;  %v2924_v32 = vld [vmem:[#allocation5 + $0x4a4] ss:$16 sps:$4 sm:$0xff]   ;;  %v2922_v34 = vld [vmem:[#allocation5 + $0x4a0] ss:$16 sps:$4 sm:$0xff]   ;;  %v2931_v39 = vld [vmem:[#allocation5 + $0xc8] ss:$16 sps:$4 sm:$0xff]  }
  0x74   :  { %1350 = vmatprep.subr.bf16.mxu0 %v2858_v41  ;;  %v2930_v36 = vld [vmem:[#allocation5 + $0x4c4] ss:$16 sps:$4 sm:$0xff]   ;;  %v2928_v38 = vld [vmem:[#allocation5 + $0x4c0] ss:$16 sps:$4 sm:$0xff]   ;;  %v100_v41 = vld [vmem:[#allocation2 + $0x28] sm:$0xff] }
  0x75   :  { %v2936_v40 = vld [vmem:[#allocation5 + $0x4e4] ss:$16 sps:$4 sm:$0xff]   ;;  %v2940_v49 = vld [vmem:[#allocation5 + $0x500] ss:$16 sps:$4 sm:$0xff]  }
  0x76   :  { %1308 = vmatpush1.bf16.msra.mxu1 %v2860_v42  ;;  %v106_v42 = vld [vmem:[#allocation2 + $0x58] sm:$0xff]  ;;  %v2948_v51 = vld [vmem:[#allocation5 + $0x524] ss:$16 sps:$4 sm:$0xff]   ;;  %v2970_v6 = vld [vmem:[#allocation5 + $0x5a0] ss:$16 sps:$4 sm:$0xff]  }
  0x77   :  { %1351 = vmatpush1.bf16.msra.mxu0 %v2861_v43  ;;  %1309 = vmatprep.subr.bf16.mxu1 %v2862_v44  ;;  %v2939_v43 = vld [vmem:[#allocation5 + $0xec] ss:$16 sps:$4 sm:$0xff]   ;;  %v3459_v44 = vpack.c.bf16 %v106_v42, %v100_v41  ;;  %v2976_v10 = vld [vmem:[#allocation5 + $0x5c0] ss:$16 sps:$4 sm:$0xff]   ;;  %v3021_v42 = vld [vmem:[#allocation5 + $0x368] ss:$16 sps:$4 sm:$0xff]  }
  0x78   :  { %1352 = vmatprep.subr.bf16.mxu0 %v2864_v45  ;;  %v2934_v45 = vld [vmem:[#allocation5 + $0x4e0] ss:$16 sps:$4 sm:$0xff]   ;;  %v3023_v41 = vld [vmem:[#allocation5 + $0x36c] ss:$16 sps:$4 sm:$0xff]  }
  0x7a   :  { %1310 = vmatpush1.bf16.msra.mxu1 %v2866_v47  ;;  %v2942_v47 = vld [vmem:[#allocation5 + $0x504] ss:$16 sps:$4 sm:$0xff]  }
  0x7b   :  { %1353 = vmatpush1.bf16.msra.mxu0 %v2867_v48  ;;  %1311 = vmatprep.subr.bf16.mxu1 %v2868_v53  ;;  %v2945_v48 = vld [vmem:[#allocation5 + $0x10c] ss:$16 sps:$4 sm:$0xff]   ;;  %v2946_v53 = vld [vmem:[#allocation5 + $0x520] ss:$16 sps:$4 sm:$0xff]  }
  0x7c   :  { %1354 = vmatprep.subr.bf16.mxu0 %v2870_v54  ;;  %v2949_v54 = vld [vmem:[#allocation5 + $0x128] ss:$16 sps:$4 sm:$0xff]  }
  0x7e   :  { %1312 = vmatpush1.bf16.msra.mxu1 %v2872_v56  ;;  %v2954_v56 = vld [vmem:[#allocation5 + $0x544] ss:$16 sps:$4 sm:$0xff]  }
  0x7f   :  { %1355 = vmatpush1.bf16.msra.mxu0 %v2873_v57  ;;  %1313 = vmatprep.subr.bf16.mxu1 %v2874_v58  ;;  %v2957_v57 = vld [vmem:[#allocation5 + $0x14c] ss:$16 sps:$4 sm:$0xff]   ;;  %v2952_v58 = vld [vmem:[#allocation5 + $0x540] ss:$16 sps:$4 sm:$0xff]  }
  0x80   :  { %1356 = vmatprep.subr.bf16.mxu0 %v2876_v59  ;;  %v2955_v59 = vld [vmem:[#allocation5 + $0x148] ss:$16 sps:$4 sm:$0xff]  }
  0x82   :  { %1314 = vmatpush1.bf16.msra.mxu1 %v2878_v60  ;;  %v2960_v60 = vld [vmem:[#allocation5 + $0x564] ss:$16 sps:$4 sm:$0xff]  }
  0x83   :  { %1357 = vmatpush1.bf16.msra.mxu0 %v2879_v61  ;;  %1315 = vmatprep.subr.bf16.mxu1 %v2880_v62  ;;  %v2963_v61 = vld [vmem:[#allocation5 + $0x16c] ss:$16 sps:$4 sm:$0xff]   ;;  %v2958_v62 = vld [vmem:[#allocation5 + $0x560] ss:$16 sps:$4 sm:$0xff]  }
  0x84   :  { %1358 = vmatprep.subr.bf16.mxu0 %v2882_v63  ;;  %v2961_v63 = vld [vmem:[#allocation5 + $0x168] ss:$16 sps:$4 sm:$0xff]  }
  0x86   :  { %1316 = vmatpush1.bf16.msra.mxu1 %v2884_v0  ;;  %v2966_v0 = vld [vmem:[#allocation5 + $0x584] ss:$16 sps:$4 sm:$0xff]  }
  0x87   :  { %1359 = vmatpush1.bf16.msra.mxu0 %v2885_v1  ;;  %1317 = vmatprep.subr.bf16.mxu1 %v2886_v2  ;;  %v2969_v1 = vld [vmem:[#allocation5 + $0x18c] ss:$16 sps:$4 sm:$0xff]   ;;  %v2964_v2 = vld [vmem:[#allocation5 + $0x580] ss:$16 sps:$4 sm:$0xff]  }
  0x88   :  { %1360 = vmatprep.subr.bf16.mxu0 %v2888_v3  ;;  %v2967_v3 = vld [vmem:[#allocation5 + $0x188] ss:$16 sps:$4 sm:$0xff]  }
  0x8a   :  { %1318 = vmatpush1.bf16.msra.mxu1 %v2890_v4  ;;  %v2972_v4 = vld [vmem:[#allocation5 + $0x5a4] ss:$16 sps:$4 sm:$0xff]  }
  0x8b   :  { %1361 = vmatpush1.bf16.msra.mxu0 %v2891_v5  ;;  %1416 = vmatprep.subr.bf16.mxu1 %v2897_v11  ;;  %v2975_v5 = vld [vmem:[#allocation5 + $0x1ac] ss:$16 sps:$4 sm:$0xff]   ;;  %v2979_v11 = vld [vmem:[#allocation5 + $0x1c8] ss:$16 sps:$4 sm:$0xff]  }
  0x8c   :  { %1373 = vmatprep.subr.bf16.mxu0 %v2894_v8  ;;  %v2978_v8 = vld [vmem:[#allocation5 + $0x5c4] ss:$16 sps:$4 sm:$0xff]  }
  0x8d   :  { %1320 = vmatmul.mubr.bf16.vlgmr.msra.gmra.mrb[0].mxu1 %v3452_v12 }
  0x8e   :  { %1363 = vmatmul.mubr.bf16.vlgmr.msra.gmra.mrb[0].mxu0 %v3454_v15  ;;  %1417 = vmatpush1.bf16.msra.mxu1 %v2895_v14  ;;  %v2987_v14 = vld [vmem:[#allocation5 + $0x1ec] ss:$16 sps:$4 sm:$0xff]  }
  0x8f   :  { %1374 = vmatpush1.bf16.msra.mxu0 %v2892_v13  ;;  %1418 = vmatprep.subr.bf16.mxu1 %v2903_v17  ;;  %v2984_v13 = vld [vmem:[#allocation5 + $0x5e4] ss:$16 sps:$4 sm:$0xff]   ;;  %v2985_v17 = vld [vmem:[#allocation5 + $0x1e8] ss:$16 sps:$4 sm:$0xff]  }
  0x90   :  { %1375 = vmatprep.subr.bf16.mxu0 %v2900_v16  ;;  %1448 = vmatprep.mubr.bf16.mxu1 %v3446_v50  ;;  %v2943_v50 = vld [vmem:[#allocation5 + $0x108] ss:$16 sps:$4 sm:$0xff]   ;;  %v2982_v16 = vld [vmem:[#allocation5 + $0x5e0] ss:$16 sps:$4 sm:$0xff]  }
  0x91   :  { %1405 = vmatprep.mubr.bf16.mxu0 %v3459_v44 }
  0x92   :  { %1419 = vmatpush1.bf16.msra.mxu1 %v2901_v19  ;;  %v105_v19 = vld [vmem:[#allocation2 + $0x50] sm:$0xff] }
  0x93   :  { %1376 = vmatpush1.bf16.msra.mxu0 %v2898_v18  ;;  %1420 = vmatprep.subr.bf16.mxu1 %v2909_v21  ;;  %v99_v18 = vld [vmem:[#allocation2 + $0x20] sm:$0xff] }
  0x94   :  { %1377 = vmatprep.subr.bf16.mxu0 %v2906_v20  ;;  %v2990_v20 = vld [vmem:[#allocation5 + $0x20c] ss:$16 sps:$4 sm:$0xff]   ;;  %v3462_v21 = vpack.c.bf16 %v105_v19, %v99_v18  ;;  %v3078_v18 = vld [vmem:[#allocation5 + $0x5c8] ss:$16 sps:$4 sm:$0xff]  }
  0x95   :  { %v3083_v19 = vld [vmem:[#allocation5 + $0x5ec] ss:$16 sps:$4 sm:$0xff]  }
  0x96   :  { %1421 = vmatpush1.bf16.msra.mxu1 %v2907_v23  ;;  %v2993_v23 = vld [vmem:[#allocation5 + $0x22c] ss:$16 sps:$4 sm:$0xff]  }
  0x97   :  { %1378 = vmatpush1.bf16.msra.mxu0 %v2904_v22  ;;  %1422 = vmatprep.subr.bf16.mxu1 %v2915_v25  ;;  %v2988_v22 = vld [vmem:[#allocation5 + $0x208] ss:$16 sps:$4 sm:$0xff]   ;;  %v2996_v25 = vld [vmem:[#allocation5 + $0x24c] ss:$16 sps:$4 sm:$0xff]  }
  0x98   :  { %1379 = vmatprep.subr.bf16.mxu0 %v2912_v24  ;;  %v2991_v24 = vld [vmem:[#allocation5 + $0x228] ss:$16 sps:$4 sm:$0xff]  }
  0x9a   :  { %1423 = vmatpush1.bf16.msra.mxu1 %v2913_v27  ;;  %v2999_v27 = vld [vmem:[#allocation5 + $0x26c] ss:$16 sps:$4 sm:$0xff]  }
  0x9b   :  { %1380 = vmatpush1.bf16.msra.mxu0 %v2910_v26  ;;  %1424 = vmatprep.subr.bf16.mxu1 %v2921_v29  ;;  %v2994_v26 = vld [vmem:[#allocation5 + $0x248] ss:$16 sps:$4 sm:$0xff]   ;;  %v3002_v29 = vld [vmem:[#allocation5 + $0x28c] ss:$16 sps:$4 sm:$0xff]  }
  0x9c   :  { %1381 = vmatprep.subr.bf16.mxu0 %v2918_v28  ;;  %v2997_v28 = vld [vmem:[#allocation5 + $0x268] ss:$16 sps:$4 sm:$0xff]  }
  0x9e   :  { %1425 = vmatpush1.bf16.msra.mxu1 %v2919_v31  ;;  %v3005_v31 = vld [vmem:[#allocation5 + $0x2ac] ss:$16 sps:$4 sm:$0xff]  }
  0x9f   :  { %1382 = vmatpush1.bf16.msra.mxu0 %v2916_v30  ;;  %1426 = vmatprep.subr.bf16.mxu1 %v2927_v33  ;;  %v3000_v30 = vld [vmem:[#allocation5 + $0x288] ss:$16 sps:$4 sm:$0xff]  }
  0xa0   :  { %1383 = vmatprep.subr.bf16.mxu0 %v2924_v32  ;;  %v3003_v32 = vld [vmem:[#allocation5 + $0x2a8] ss:$16 sps:$4 sm:$0xff]  }
  0xa1   :  { %v3006_v33 = vld [vmem:[#allocation5 + $0x2c8] ss:$16 sps:$4 sm:$0xff]  }
  0xa2   :  { %1427 = vmatpush1.bf16.msra.mxu1 %v2925_v35  ;;  %v3014_v35 = vld [vmem:[#allocation5 + $0x30c] ss:$16 sps:$4 sm:$0xff]  }
  0xa3   :  { %1384 = vmatpush1.bf16.msra.mxu0 %v2922_v34  ;;  %1428 = vmatprep.subr.bf16.mxu1 %v2933_v37  ;;  %v3011_v34 = vld [vmem:[#allocation5 + $0x2ec] ss:$16 sps:$4 sm:$0xff]  }
  0xa4   :  { %1385 = vmatprep.subr.bf16.mxu0 %v2930_v36  ;;  %v3012_v36 = vld [vmem:[#allocation5 + $0x308] ss:$16 sps:$4 sm:$0xff]   ;;  %v3017_v37 = vld [vmem:[#allocation5 + $0x32c] ss:$16 sps:$4 sm:$0xff]  }
  0xa6   :  { %1429 = vmatpush1.bf16.msra.mxu1 %v2931_v39  ;;  %v3020_v39 = vld [vmem:[#allocation5 + $0x34c] ss:$16 sps:$4 sm:$0xff]  }
  0xa7   :  { %1386 = vmatpush1.bf16.msra.mxu0 %v2928_v38  ;;  %1430 = vmatprep.subr.bf16.mxu1 %v2939_v43  ;;  %v3015_v38 = vld [vmem:[#allocation5 + $0x328] ss:$16 sps:$4 sm:$0xff]   ;;  %v3026_v43 = vld [vmem:[#allocation5 + $0x38c] ss:$16 sps:$4 sm:$0xff]  }
  0xa8   :  { %1387 = vmatprep.subr.bf16.mxu0 %v2936_v40  ;;  %v3018_v40 = vld [vmem:[#allocation5 + $0x348] ss:$16 sps:$4 sm:$0xff]  }
  0xaa   :  { %1431 = vmatpush1.bf16.msra.mxu1 %v2937_v46  ;;  %v3029_v46 = vld [vmem:[#allocation5 + $0x3ac] ss:$16 sps:$4 sm:$0xff]  }
  0xab   :  { %1388 = vmatpush1.bf16.msra.mxu0 %v2934_v45  ;;  %1432 = vmatprep.subr.bf16.mxu1 %v2945_v48  ;;  %v3024_v45 = vld [vmem:[#allocation5 + $0x388] ss:$16 sps:$4 sm:$0xff]   ;;  %v3032_v48 = vld [vmem:[#allocation5 + $0x3cc] ss:$16 sps:$4 sm:$0xff]  }
  0xac   :  { %1389 = vmatprep.subr.bf16.mxu0 %v2942_v47  ;;  %v3027_v47 = vld [vmem:[#allocation5 + $0x3a8] ss:$16 sps:$4 sm:$0xff]  }
  0xae   :  { %1433 = vmatpush1.bf16.msra.mxu1 %v2943_v50  ;;  %v3035_v50 = vld [vmem:[#allocation5 + $0x3ec] ss:$16 sps:$4 sm:$0xff]  }
  0xaf   :  { %1390 = vmatpush1.bf16.msra.mxu0 %v2940_v49  ;;  %1434 = vmatprep.subr.bf16.mxu1 %v2951_v52  ;;  %v3030_v49 = vld [vmem:[#allocation5 + $0x3c8] ss:$16 sps:$4 sm:$0xff]   ;;  %v3038_v52 = vld [vmem:[#allocation5 + $0x40c] ss:$16 sps:$4 sm:$0xff]  }
  0xb0   :  { %1391 = vmatprep.subr.bf16.mxu0 %v2948_v51  ;;  %v3033_v51 = vld [vmem:[#allocation5 + $0x3e8] ss:$16 sps:$4 sm:$0xff]  }
  0xb2   :  { %1435 = vmatpush1.bf16.msra.mxu1 %v2949_v54  ;;  %v3041_v54 = vld [vmem:[#allocation5 + $0x42c] ss:$16 sps:$4 sm:$0xff]  }
  0xb3   :  { %1392 = vmatpush1.bf16.msra.mxu0 %v2946_v53  ;;  %1436 = vmatprep.subr.bf16.mxu1 %v2957_v57  ;;  %v3036_v53 = vld [vmem:[#allocation5 + $0x408] ss:$16 sps:$4 sm:$0xff]   ;;  %v3044_v57 = vld [vmem:[#allocation5 + $0x44c] ss:$16 sps:$4 sm:$0xff]  }
  0xb4   :  { %1393 = vmatprep.subr.bf16.mxu0 %v2954_v56  ;;  %v3039_v56 = vld [vmem:[#allocation5 + $0x428] ss:$16 sps:$4 sm:$0xff]  }
  0xb6   :  { %1437 = vmatpush1.bf16.msra.mxu1 %v2955_v59  ;;  %v3047_v59 = vld [vmem:[#allocation5 + $0x46c] ss:$16 sps:$4 sm:$0xff]  }
  0xb7   :  { %1394 = vmatpush1.bf16.msra.mxu0 %v2952_v58  ;;  %1438 = vmatprep.subr.bf16.mxu1 %v2963_v61  ;;  %v3042_v58 = vld [vmem:[#allocation5 + $0x448] ss:$16 sps:$4 sm:$0xff]   ;;  %v3050_v61 = vld [vmem:[#allocation5 + $0x48c] ss:$16 sps:$4 sm:$0xff]  }
  0xb8   :  { %1395 = vmatprep.subr.bf16.mxu0 %v2960_v60  ;;  %v3045_v60 = vld [vmem:[#allocation5 + $0x468] ss:$16 sps:$4 sm:$0xff]  }
  0xba   :  { %1439 = vmatpush1.bf16.msra.mxu1 %v2961_v63  ;;  %v3053_v63 = vld [vmem:[#allocation5 + $0x4ac] ss:$16 sps:$4 sm:$0xff]  }
  0xbb   :  { %1396 = vmatpush1.bf16.msra.mxu0 %v2958_v62  ;;  %1440 = vmatprep.subr.bf16.mxu1 %v2969_v1  ;;  %v3048_v62 = vld [vmem:[#allocation5 + $0x488] ss:$16 sps:$4 sm:$0xff]   ;;  %v3059_v1 = vld [vmem:[#allocation5 + $0x4ec] ss:$16 sps:$4 sm:$0xff]  }
  0xbc   :  { %1397 = vmatprep.subr.bf16.mxu0 %v2966_v0  ;;  %v3056_v0 = vld [vmem:[#allocation5 + $0x4cc] ss:$16 sps:$4 sm:$0xff]  }
  0xbe   :  { %1441 = vmatpush1.bf16.msra.mxu1 %v2967_v3  ;;  %v3062_v3 = vld [vmem:[#allocation5 + $0x50c] ss:$16 sps:$4 sm:$0xff]  }
  0xbf   :  { %1398 = vmatpush1.bf16.msra.mxu0 %v2964_v2  ;;  %1442 = vmatprep.subr.bf16.mxu1 %v2975_v5  ;;  %v3057_v2 = vld [vmem:[#allocation5 + $0x4e8] ss:$16 sps:$4 sm:$0xff]   ;;  %v3065_v5 = vld [vmem:[#allocation5 + $0x52c] ss:$16 sps:$4 sm:$0xff]  }
  0xc0   :  { %1399 = vmatprep.subr.bf16.mxu0 %v2972_v4  ;;  %v3060_v4 = vld [vmem:[#allocation5 + $0x508] ss:$16 sps:$4 sm:$0xff]  }
  0xc2   :  { %1443 = vmatpush1.bf16.msra.mxu1 %v2973_v7  ;;  %v3068_v7 = vld [vmem:[#allocation5 + $0x54c] ss:$16 sps:$4 sm:$0xff]  }
  0xc3   :  { %1400 = vmatpush1.bf16.msra.mxu0 %v2970_v6  ;;  %1444 = vmatprep.subr.bf16.mxu1 %v2981_v9  ;;  %v3063_v6 = vld [vmem:[#allocation5 + $0x528] ss:$16 sps:$4 sm:$0xff]   ;;  %v3071_v9 = vld [vmem:[#allocation5 + $0x56c] ss:$16 sps:$4 sm:$0xff]  }
  0xc4   :  { %1401 = vmatprep.subr.bf16.mxu0 %v2978_v8  ;;  %v3066_v8 = vld [vmem:[#allocation5 + $0x548] ss:$16 sps:$4 sm:$0xff]  }
  0xc6   :  { %1445 = vmatpush1.bf16.msra.mxu1 %v2979_v11  ;;  %v3074_v11 = vld [vmem:[#allocation5 + $0x58c] ss:$16 sps:$4 sm:$0xff]  }
  0xc7   :  { %1402 = vmatpush1.bf16.msra.mxu0 %v2976_v10  ;;  %1446 = vmatprep.subr.bf16.mxu1 %v2987_v14  ;;  %v3069_v10 = vld [vmem:[#allocation5 + $0x568] ss:$16 sps:$4 sm:$0xff]   ;;  %v3077_v14 = vld [vmem:[#allocation5 + $0x5ac] ss:$16 sps:$4 sm:$0xff]  }
  0xc8   :  { %1403 = vmatprep.subr.bf16.mxu0 %v2984_v13  ;;  %v3072_v13 = vld [vmem:[#allocation5 + $0x588] ss:$16 sps:$4 sm:$0xff]  }
  0xca   :  { %1447 = vmatpush1.bf16.msra.mxu1 %v2985_v17  ;;  %v3080_v17 = vld [vmem:[#allocation5 + $0x5cc] ss:$16 sps:$4 sm:$0xff]  }
  0xcb   :  { %1404 = vmatpush1.bf16.msra.mxu0 %v2982_v16  ;;  %1459 = vmatprep.subr.bf16.mxu1 %v2990_v20  ;;  %v3075_v16 = vld [vmem:[#allocation5 + $0x5a8] ss:$16 sps:$4 sm:$0xff]  }
  0xcc   :  { %v3081_v20 = vld [vmem:[#allocation5 + $0x5e8] ss:$16 sps:$4 sm:$0xff]  }
  0xcd   :  { %1449 = vmatmul.mubr.bf16.vlgmr.msra.gmra.mrb[4].mxu1 %v3452_v12  ;;  %v3008_v12 = vld [vmem:[#allocation5 + $0x2cc] ss:$16 sps:$4 sm:$0xff]  }
  0xce   :  { %1406 = vmatmul.mubr.bf16.vlgmr.msra.gmra.mrb[0].mxu0 %v3462_v21  ;;  %1460 = vmatpush1.bf16.msra.mxu1 %v2988_v22 }
  0xcf   :  { %1491 = vmatprep.mubr.bf16.mxu1 %v3448_v55  ;;  %1461 = vmatprep.subr.bf16.mxu1 %v2993_v23  ;;  %v3009_v55 = vld [vmem:[#allocation5 + $0x2e8] ss:$16 sps:$4 sm:$0xff]  }
  0xd2   :  { %1462 = vmatpush1.bf16.msra.mxu1 %v2991_v24 }
  0xd3   :  { %1463 = vmatprep.subr.bf16.mxu1 %v2996_v25 }
  0xd6   :  { %1464 = vmatpush1.bf16.msra.mxu1 %v2994_v26  ;;  %v307_v26 = vlaneseq }
  0xd7   :  { %1465 = vmatprep.subr.bf16.mxu1 %v2999_v27 }
  0xd8   :  { %v308_v27 = vshrl.u32 %v307_v26, 7 }
  0xda   :  { %1466 = vmatpush1.bf16.msra.mxu1 %v2997_v28  ;;  %v3470_v28 = vsub.s32 0, %v308_v27 }
  0xdb   :  { %1467 = vmatprep.subr.bf16.mxu1 %v3002_v29  ;;  %v305_v29 = vld [vmem:[%s3613_s2] sm:$0xf] }
  0xde   :  { %1468 = vmatpush1.bf16.msra.mxu1 %v3000_v30  ;;  %v3475_v30 = vsub.s32 1, %v308_v27 }
  0xdf   :  { %1469 = vmatprep.subr.bf16.mxu1 %v3005_v31  ;;  %v310_v31 = vrot.slane %v305_v29, %v3470_v28 }
  0xe2   :  { %1470 = vmatpush1.bf16.msra.mxu1 %v3003_v32  ;;  %v314_v32 = vrot.slane %v305_v29, %v3475_v30 }
  0xe3   :  { %1471 = vmatprep.subr.bf16.mxu1 %v3008_v12 }
  0xe6   :  { %1472 = vmatpush1.bf16.msra.mxu1 %v3006_v33 }
  0xe7   :  { %1473 = vmatprep.subr.bf16.mxu1 %v3011_v34 }
  0xea   :  { %1474 = vmatpush1.bf16.msra.mxu1 %v3009_v55 }
  0xeb   :  { %1475 = vmatprep.subr.bf16.mxu1 %v3014_v35 }
  0xee   :  { %1476 = vmatpush1.bf16.msra.mxu1 %v3012_v36 }
  0xef   :  { %1477 = vmatprep.subr.bf16.mxu1 %v3017_v37 }
  0xf2   :  { %1478 = vmatpush1.bf16.msra.mxu1 %v3015_v38 }
  0xf3   :  { %1479 = vmatprep.subr.bf16.mxu1 %v3020_v39 }
  0xf6   :  { %1480 = vmatpush1.bf16.msra.mxu1 %v3018_v40 }
  0xf7   :  { %1481 = vmatprep.subr.bf16.mxu1 %v3023_v41 }
  0xfa   :  { %1482 = vmatpush1.bf16.msra.mxu1 %v3021_v42  ;;  %v3084_v42 = vld [vmem:[#allocation7] ss:$8 sps:$4 sm:$0xff]  }
  0xfb   :  { %1483 = vmatprep.subr.bf16.mxu1 %v3026_v43  ;;  %v3086_v43 = vld [vmem:[#allocation7 + $0x4] ss:$8 sps:$4 sm:$0xff]  }
  0xfc   :  { %2088 = vmatprep.subr.bf16.mxu0 %v3086_v43  ;;  %v3123_v43 = vld [vmem:[#allocation7 + $0xd0] ss:$8 sps:$4 sm:$0xff]  }
  0xfd   :  { %2089 = vmatpush1.bf16.msra.mxu0 %v3084_v42  ;;  %v3125_v42 = vld [vmem:[#allocation7 + $0xd4] ss:$8 sps:$4 sm:$0xff]  }
  0xfe   :  { %1484 = vmatpush1.bf16.msra.mxu1 %v3024_v45  ;;  %v3089_v45 = vld [vmem:[#allocation7 + $0x14] ss:$8 sps:$4 sm:$0xff]  }
  0xff   :  { %1485 = vmatprep.subr.bf16.mxu1 %v3029_v46  ;;  %v3087_v46 = vld [vmem:[#allocation7 + $0x10] ss:$8 sps:$4 sm:$0xff]   ;;  %2090 = vmatprep.subr.bf16.mxu0 %v3089_v45  ;;  %v3128_v45 = vld [vmem:[#allocation7 + $0xe4] ss:$8 sps:$4 sm:$0xff]  }
 0x101   :  { %2091 = vmatpush1.bf16.msra.mxu0 %v3087_v46  ;;  %v3126_v46 = vld [vmem:[#allocation7 + $0xe0] ss:$8 sps:$4 sm:$0xff]  }
 0x102   :  { %1486 = vmatpush1.bf16.msra.mxu1 %v3027_v47  ;;  %v3092_v47 = vld [vmem:[#allocation7 + $0x24] ss:$8 sps:$4 sm:$0xff]  }
 0x103   :  { %1487 = vmatprep.subr.bf16.mxu1 %v3032_v48  ;;  %v3090_v48 = vld [vmem:[#allocation7 + $0x20] ss:$8 sps:$4 sm:$0xff]   ;;  %2092 = vmatprep.subr.bf16.mxu0 %v3092_v47  ;;  %v3131_v47 = vld [vmem:[#allocation7 + $0xf4] ss:$8 sps:$4 sm:$0xff]  }
 0x105   :  { %2093 = vmatpush1.bf16.msra.mxu0 %v3090_v48  ;;  %v3129_v48 = vld [vmem:[#allocation7 + $0xf0] ss:$8 sps:$4 sm:$0xff]  }
 0x106   :  { %1488 = vmatpush1.bf16.msra.mxu1 %v3030_v49  ;;  %v3095_v49 = vld [vmem:[#allocation7 + $0x34] ss:$8 sps:$4 sm:$0xff]  }
 0x107   :  { %1489 = vmatprep.subr.bf16.mxu1 %v3035_v50  ;;  %v3093_v50 = vld [vmem:[#allocation7 + $0x30] ss:$8 sps:$4 sm:$0xff]   ;;  %2094 = vmatprep.subr.bf16.mxu0 %v3095_v49  ;;  %v3134_v49 = vld [vmem:[#allocation7 + $0x104] ss:$8 sps:$4 sm:$0xff]  }
 0x109   :  { %2095 = vmatpush1.bf16.msra.mxu0 %v3093_v50 }
 0x10a   :  { %1490 = vmatpush1.bf16.msra.mxu1 %v3033_v51  ;;  %v3098_v51 = vld [vmem:[#allocation7 + $0x44] ss:$8 sps:$4 sm:$0xff]  }
 0x10b   :  { %1502 = vmatprep.subr.bf16.mxu1 %v3038_v52  ;;  %v3096_v52 = vld [vmem:[#allocation7 + $0x40] ss:$8 sps:$4 sm:$0xff]   ;;  %2096 = vmatprep.subr.bf16.mxu0 %v3098_v51 }
 0x10d   :  { %1492 = vmatmul.mubr.bf16.vlgmr.msra.gmra.mrb[4].mxu1 %v3454_v15  ;;  %v3051_v15 = vld [vmem:[#allocation5 + $0x4a8] ss:$16 sps:$4 sm:$0xff]   ;;  %2097 = vmatpush1.bf16.msra.mxu0 %v3096_v52 }
 0x10e   :  { %1503 = vmatpush1.bf16.msra.mxu1 %v3036_v53  ;;  %1534 = vmatprep.mubr.bf16.mxu1 %v3459_v44  ;;  %v3054_v44 = vld [vmem:[#allocation5 + $0x4c8] ss:$16 sps:$4 sm:$0xff]   ;;  %v3101_v53 = vld [vmem:[#allocation7 + $0x54] ss:$8 sps:$4 sm:$0xff]  }
 0x10f   :  { %1504 = vmatprep.subr.bf16.mxu1 %v3041_v54  ;;  %v3099_v54 = vld [vmem:[#allocation7 + $0x50] ss:$8 sps:$4 sm:$0xff]   ;;  %2098 = vmatprep.subr.bf16.mxu0 %v3101_v53 }
 0x111   :  { %2099 = vmatpush1.bf16.msra.mxu0 %v3099_v54 }
 0x112   :  { %1505 = vmatpush1.bf16.msra.mxu1 %v3039_v56  ;;  %v3104_v56 = vld [vmem:[#allocation7 + $0x64] ss:$8 sps:$4 sm:$0xff]  }
 0x113   :  { %1506 = vmatprep.subr.bf16.mxu1 %v3044_v57  ;;  %v3102_v57 = vld [vmem:[#allocation7 + $0x60] ss:$8 sps:$4 sm:$0xff]   ;;  %2100 = vmatprep.subr.bf16.mxu0 %v3104_v56 }
 0x115   :  { %2101 = vmatpush1.bf16.msra.mxu0 %v3102_v57 }
 0x116   :  { %1507 = vmatpush1.bf16.msra.mxu1 %v3042_v58  ;;  %v3487_v58 = vsub.s32 2, %v308_v27 }
 0x117   :  { %1508 = vmatprep.subr.bf16.mxu1 %v3047_v59  ;;  %v3489_v59 = vsub.s32 3, %v308_v27  ;;  %v3107_v27 = vld [vmem:[#allocation7 + $0x74] ss:$8 sps:$4 sm:$0xff]  }
 0x118   :  { %2102 = vmatprep.subr.bf16.mxu0 %v3107_v27 }
 0x11a   :  { %1509 = vmatpush1.bf16.msra.mxu1 %v3045_v60  ;;  %v318_v60 = vrot.slane %v305_v29, %v3487_v58 }
 0x11b   :  { %1510 = vmatprep.subr.bf16.mxu1 %v3050_v61  ;;  %v322_v61 = vrot.slane %v305_v29, %v3489_v59  ;;  %v3105_v29 = vld [vmem:[#allocation7 + $0x70] ss:$8 sps:$4 sm:$0xff]  }
 0x11c   :  { %2103 = vmatpush1.bf16.msra.mxu0 %v3105_v29 }
 0x11e   :  { %1511 = vmatpush1.bf16.msra.mxu1 %v3048_v62 }
 0x11f   :  { %1512 = vmatprep.subr.bf16.mxu1 %v3053_v63 }
 0x122   :  { %1513 = vmatpush1.bf16.msra.mxu1 %v3051_v15 }
 0x123   :  { %1514 = vmatprep.subr.bf16.mxu1 %v3056_v0 }
 0x126   :  { %1515 = vmatpush1.bf16.msra.mxu1 %v3054_v44 }
 0x127   :  { %1516 = vmatprep.subr.bf16.mxu1 %v3059_v1 }
 0x12a   :  { %1517 = vmatpush1.bf16.msra.mxu1 %v3057_v2 }
 0x12b   :  { %1518 = vmatprep.subr.bf16.mxu1 %v3062_v3 }
 0x12e   :  { %1519 = vmatpush1.bf16.msra.mxu1 %v3060_v4 }
 0x12f   :  { %1520 = vmatprep.subr.bf16.mxu1 %v3065_v5 }
 0x132   :  { %1521 = vmatpush1.bf16.msra.mxu1 %v3063_v6 }
 0x133   :  { %1522 = vmatprep.subr.bf16.mxu1 %v3068_v7 }
 0x136   :  { %1523 = vmatpush1.bf16.msra.mxu1 %v3066_v8 }
 0x137   :  { %1524 = vmatprep.subr.bf16.mxu1 %v3071_v9 }
 0x13a   :  { %1525 = vmatpush1.bf16.msra.mxu1 %v3069_v10 }
 0x13b   :  { %1526 = vmatprep.subr.bf16.mxu1 %v3074_v11 }
 0x13e   :  { %1527 = vmatpush1.bf16.msra.mxu1 %v3072_v13 }
 0x13f   :  { %1528 = vmatprep.subr.bf16.mxu1 %v3077_v14 }
 0x142   :  { %1529 = vmatpush1.bf16.msra.mxu1 %v3075_v16 }
 0x143   :  { %1530 = vmatprep.subr.bf16.mxu1 %v3080_v17 }
 0x146   :  { %1531 = vmatpush1.bf16.msra.mxu1 %v3078_v18 }
 0x147   :  { %1532 = vmatprep.subr.bf16.mxu1 %v3083_v19 }
 0x14a   :  { %1533 = vmatpush1.bf16.msra.mxu1 %v3081_v20 }
 0x14d   :  { %1535 = vmatmul.mubr.bf16.vlgmr.msra.gmra.mrb[4].mxu1 %v3462_v21 }
 0x160   :  { %v1321_v22 = vpop.f32.mrb[0].mxu1 }
 0x161   :  { %v1323_v23 = vpop.f32.mrb[1].mxu1  ;;  %v1322_v12 = vadd.f32 %v1321_v22, %v310_v31 }
 0x162   :  { %v1325_v24 = vpop.f32.mrb[2].mxu1  ;;  %v1324_v21 = vadd.f32 %v1323_v23, %v314_v32 }
 0x163   :  { %v1327_v25 = vpop.f32.mrb[3].mxu1  ;;  %v1326_v34 = vadd.f32 %v1325_v24, %v310_v31  ;;  %v3110_v31 = vld [vmem:[#allocation7 + $0x84] ss:$8 sps:$4 sm:$0xff]  }
 0x164   :  { %v1328_v36 = vadd.f32 %v1327_v25, %v314_v32  ;;  %v3108_v32 = vld [vmem:[#allocation7 + $0x80] ss:$8 sps:$4 sm:$0xff]   ;;  %2104 = vmatprep.subr.bf16.mxu0 %v3110_v31 }
 0x165   :  { %2105 = vmatpush1.bf16.msra.mxu0 %v3108_v32 }
 0x1a1   :  { %v1407_v33 = vpop.f32.mrb[0].mxu0 }
 0x1a2   :  { %v3479_v55 = vadd.f32 %v1407_v33, %v1322_v12  ;;  %v1409_v35 = vpop.f32.mrb[1].mxu0  ;;  %v3113_v12 = vld [vmem:[#allocation7 + $0x94] ss:$8 sps:$4 sm:$0xff]   ;;  %v3116_v33 = vld [vmem:[#allocation7 + $0xa4] ss:$8 sps:$4 sm:$0xff]  }
 0x1a3   :  { %v3481_v37 = vadd.f32 %v1409_v35, %v1324_v21  ;;  %v1411_v38 = vpop.f32.mrb[2].mxu0  ;;  %v3111_v21 = vld [vmem:[#allocation7 + $0x90] ss:$8 sps:$4 sm:$0xff]   ;;  %2106 = vmatprep.subr.bf16.mxu0 %v3113_v12 }
 0x1a4   :  { %v3483_v39 = vadd.f32 %v1411_v38, %v1326_v34  ;;  %v1413_v40 = vpop.f32.mrb[3].mxu0  ;;  %v1560_v62 = vmul.f32 %v3479_v55, %v3479_v55  ;;  %2107 = vmatpush1.bf16.msra.mxu0 %v3111_v21  ;;  %v3114_v34 = vld [vmem:[#allocation7 + $0xa0] ss:$8 sps:$4 sm:$0xff]   ;;  %v3117_v35 = vld [vmem:[#allocation7 + $0xb0] ss:$8 sps:$4 sm:$0xff]  }
 0x1a5   :  { %v3485_v41 = vadd.f32 %v1413_v40, %v1328_v36  ;;  %v1561_v63 = vmul.f32 %v3481_v37, %v3481_v37  ;;  %v1547_v3 = vadd.f32 %v3481_v37, %v3479_v55  ;;  %2108 = vmatprep.subr.bf16.mxu0 %v3116_v33  ;;  %v3119_v36 = vld [vmem:[#allocation7 + $0xb4] ss:$8 sps:$4 sm:$0xff]   ;;  %v3122_v38 = vld [vmem:[#allocation7 + $0xc4] ss:$8 sps:$4 sm:$0xff]   ;;  %v3120_v40 = vld [vmem:[#allocation7 + $0xc0] ss:$8 sps:$4 sm:$0xff]  }
 0x1a6   :  { %v1564_v15 = vmul.f32 %v3483_v39, %v3483_v39 }
 0x1a7   :  { %v1565_v0 = vmul.f32 %v3485_v41, %v3485_v41  ;;  %v1552_v4 = vadd.f32 %v3485_v41, %v3483_v39  ;;  %v1568_v11 = vadd.f32 %v1561_v63, %v1560_v62 }
 0x1a8   :  { %2109 = vmatpush1.bf16.msra.mxu0 %v3114_v34 }
 0x1a9   :  { %v1573_v16 = vadd.f32 %v1565_v0, %v1564_v15  ;;  %2110 = vmatprep.subr.bf16.mxu0 %v3119_v36 }
 0x1ac   :  { %2111 = vmatpush1.bf16.msra.mxu0 %v3117_v35 }
 0x1ad   :  { %2112 = vmatprep.subr.bf16.mxu0 %v3122_v38 }
 0x1b0   :  { %2113 = vmatpush1.bf16.msra.mxu0 %v3120_v40 }
 0x1b1   :  { %2114 = vmatprep.subr.bf16.mxu0 %v3125_v42 }
 0x1b4   :  { %2115 = vmatpush1.bf16.msra.mxu0 %v3123_v43 }
 0x1b5   :  { %2116 = vmatprep.subr.bf16.mxu0 %v3128_v45 }
 0x1b8   :  { %2117 = vmatpush1.bf16.msra.mxu0 %v3126_v46 }
 0x1b9   :  { %2118 = vmatprep.subr.bf16.mxu0 %v3131_v47 }
 0x1bc   :  { %2119 = vmatpush1.bf16.msra.mxu0 %v3129_v48 }
 0x1bd   :  { %2131 = vmatprep.subr.bf16.mxu0 %v3134_v49 }
 0x220   :  { %v1536_v44 = vpop.f32.mrb[4].mxu1 }
 0x221   :  { %v3501_v1 = vadd.f32 %v1536_v44, %v318_v60  ;;  %v1538_v2 = vpop.f32.mrb[5].mxu1 }
 0x222   :  { %v3507_v5 = vadd.f32 %v1538_v2, %v322_v61  ;;  %v1540_v6 = vpop.f32.mrb[6].mxu1 }
 0x223   :  { %v3509_v7 = vadd.f32 %v1540_v6, %v318_v60  ;;  %v1542_v8 = vpop.f32.mrb[7].mxu1  ;;  %v1548_v9 = vadd.f32 %v3501_v1, %v1547_v3  ;;  %v1562_v10 = vmul.f32 %v3501_v1, %v3501_v1  ;;  %v1546_v6 = vld [vmem:[%s3615_s4] sm:$0xf] }
 0x224   :  { %v3514_v13 = vadd.f32 %v1542_v8, %v322_v61  ;;  %v1563_v14 = vmul.f32 %v3507_v5, %v3507_v5  ;;  %v1647_v32 = vrot.slane %v1546_v6, %v3487_v58 }
 0x225   :  { %v1566_v17 = vmul.f32 %v3509_v7, %v3509_v7  ;;  %v1549_v18 = vadd.f32 %v3507_v5, %v1548_v9  ;;  %v1569_v19 = vadd.f32 %v1568_v11, %v1562_v10  ;;  %v1553_v20 = vadd.f32 %v3509_v7, %v1552_v4  ;;  %v1545_v4 = vld [vmem:[%s3614_s3] sm:$0xf] }
 0x226   :  { %v1567_v23 = vmul.f32 %v3514_v13, %v3514_v13  ;;  %v1622_v8 = vrot.slane %v1545_v4, %v3489_v59  ;;  %v1614_v9 = vrot.slane %v1545_v4, %v3475_v30  ;;  %v1610_v10 = vrot.slane %v1545_v4, %v3470_v28 }
 0x227   :  { %1550 = vadd.xlane.f32.xlu0 %v1549_v18  ;;  %v1570_v22 = vadd.f32 %v1569_v19, %v1563_v14  ;;  %v1574_v24 = vadd.f32 %v1573_v16, %v1566_v17  ;;  %v1554_v25 = vadd.f32 %v3514_v13, %v1553_v20  ;;  %v1618_v19 = vrot.slane %v1545_v4, %v3487_v58 }
 0x228   :  { %v1643_v20 = vrot.slane %v1546_v6, %v3475_v30 }
 0x229   :  { %1571 = vadd.xlane.f32.xlu1 %v1570_v22  ;;  %v1575_v26 = vadd.f32 %v1574_v24, %v1567_v23  ;;  %v1639_v22 = vrot.slane %v1546_v6, %v3470_v28 }
 0x22b   :  { %1555 = vadd.xlane.f32.xlu0 %v1554_v25 }
 0x22d   :  { %1576 = vadd.xlane.f32.xlu1 %v1575_v26 }
 0x2b4   :  { %v1551_v50 = vpop.xlane.xlu0 %1550 }
 0x2b5   :  { %v1558_v51 = vmul.f32 0.001953125, %v1551_v50 }
 0x2b6   :  { %v1572_v52 = vpop.xlane.xlu1 %1571 }
 0x2b7   :  { %v1578_v53 = vmul.f32 0.001953125, %v1572_v52  ;;  %v1580_v54 = vmul.f32 %v1558_v51, %v1558_v51  ;;  %v1586_v11 = vsub.f32 %v3479_v55, %v1558_v51  ;;  %v1587_v14 = vsub.f32 %v3481_v37, %v1558_v51 }
 0x2b8   :  { %v1556_v56 = vpop.xlane.xlu0 %1555  ;;  %v1588_v16 = vsub.f32 %v3501_v1, %v1558_v51  ;;  %v1589_v17 = vsub.f32 %v3507_v5, %v1558_v51  ;;  %v1651_v55 = vrot.slane %v1546_v6, %v3489_v59 }
 0x2b9   :  { %v1559_v57 = vmul.f32 0.001953125, %v1556_v56  ;;  %v1582_v60 = vsub.f32 %v1578_v53, %v1580_v54 }
 0x2ba   :  { %v1577_v61 = vpop.xlane.xlu1 %1576 }
 0x2bb   :  { %v1584_v62 = vmax.f32 %v1582_v60, 0.0  ;;  %v1579_v63 = vmul.f32 0.001953125, %v1577_v61  ;;  %v1581_v15 = vmul.f32 %v1559_v57, %v1559_v57  ;;  %v1590_v27 = vsub.f32 %v3483_v39, %v1559_v57 }
 0x2bc   :  { %v1591_v37 = vsub.f32 %v3485_v41, %v1559_v57  ;;  %v1592_v12 = vsub.f32 %v3509_v7, %v1559_v57  ;;  %v1593_v21 = vsub.f32 %v3514_v13, %v1559_v57 }
 0x2bd   :  { %v1594_v0 = vadd.f32 1e-05, %v1584_v62  ;;  %v1583_v44 = vsub.f32 %v1579_v63, %v1581_v15  ;;  %v3132_v63 = vld [vmem:[#allocation7 + $0x100] ss:$8 sps:$4 sm:$0xff]  }
 0x2bf   :  { %3196 = vrsqrt.f32 %v1594_v0  ;;  %v1585_v2 = vmax.f32 %v1583_v44, 0.0 }
 0x2c1   :  { %v1595_v3 = vadd.f32 1e-05, %v1585_v2  ;;  %v3137_v2 = vld [vmem:[#allocation7 + $0x114] ss:$8 sps:$4 sm:$0xff]  }
 0x2c3   :  { %3198 = vrsqrt.f32 %v1595_v3 }
 0x2c9   :  { %v3197_v18 = vpop.eup %3196 }
 0x2ca   :  { %v1599_v23 = vmul.f32 %v3197_v18, %v1587_v14  ;;  %v1598_v24 = vmul.f32 %v3197_v18, %v1586_v11  ;;  %v1601_v25 = vmul.f32 %v3197_v18, %v1589_v17  ;;  %v1600_v26 = vmul.f32 %v3197_v18, %v1588_v16  ;;  %v3140_v11 = vld [vmem:[#allocation7 + $0x124] ss:$8 sps:$4 sm:$0xff]   ;;  %v3138_v14 = vld [vmem:[#allocation7 + $0x120] ss:$8 sps:$4 sm:$0xff]   ;;  %v3143_v16 = vld [vmem:[#allocation7 + $0x134] ss:$8 sps:$4 sm:$0xff]  }
 0x2cb   :  { %v3141_v17 = vld [vmem:[#allocation7 + $0x130] ss:$8 sps:$4 sm:$0xff]   ;;  %v3146_v18 = vld [vmem:[#allocation7 + $0x144] ss:$8 sps:$4 sm:$0xff]  }
 0x2cc   :  { %v1628_v1 = vmul.f32 %v1614_v9, %v1599_v23  ;;  %v1627_v29 = vmul.f32 %v1610_v10, %v1598_v24  ;;  %v1630_v5 = vmul.f32 %v1622_v8, %v1601_v25  ;;  %v1629_v33 = vmul.f32 %v1618_v19, %v1600_v26  ;;  %v3152_v23 = vld [vmem:[#allocation7 + $0x164] ss:$8 sps:$4 sm:$0xff]   ;;  %v3150_v24 = vld [vmem:[#allocation7 + $0x160] ss:$8 sps:$4 sm:$0xff]   ;;  %v3155_v25 = vld [vmem:[#allocation7 + $0x174] ss:$8 sps:$4 sm:$0xff]  }
 0x2cd   :  { %v3199_v31 = vpop.eup %3198  ;;  %v3153_v26 = vld [vmem:[#allocation7 + $0x170] ss:$8 sps:$4 sm:$0xff]  }
 0x2ce   :  { %v1603_v34 = vmul.f32 %v3199_v31, %v1591_v37  ;;  %v1657_v35 = vadd.f32 %v1643_v20, %v1628_v1  ;;  %v1602_v36 = vmul.f32 %v3199_v31, %v1590_v27  ;;  %v1656_v38 = vadd.f32 %v1639_v22, %v1627_v29  ;;  %v3158_v27 = vld [vmem:[#allocation7 + $0x184] ss:$8 sps:$4 sm:$0xff]   ;;  %v3161_v37 = vld [vmem:[#allocation7 + $0x194] ss:$8 sps:$4 sm:$0xff]   ;;  %v3159_v1 = vld [vmem:[#allocation7 + $0x190] ss:$8 sps:$4 sm:$0xff]  }
 0x2cf   :  { %v1605_v39 = vmul.f32 %v3199_v31, %v1593_v21  ;;  %v1659_v40 = vadd.f32 %v1651_v55, %v1630_v5  ;;  %v1604_v59 = vmul.f32 %v3199_v31, %v1592_v12  ;;  %v1658_v47 = vadd.f32 %v1647_v32, %v1629_v33  ;;  %v3164_v29 = vld [vmem:[#allocation7 + $0x1a4] ss:$8 sps:$4 sm:$0xff]   ;;  %v3162_v5 = vld [vmem:[#allocation7 + $0x1a0] ss:$8 sps:$4 sm:$0xff]   ;;  %v3167_v31 = vld [vmem:[#allocation7 + $0x1b4] ss:$8 sps:$4 sm:$0xff]  }
 0x2d0   :  { %v1632_v42 = vmul.f32 %v1614_v9, %v1603_v34  ;;  %vm1665_vm0 = vcmp.gt.f32.partialorder %v1657_v35, 0.0  ;;  %v1673_v41 = vmul.f32 0.01, %v1657_v35  ;;  %v1631_v43 = vmul.f32 %v1610_v10, %v1602_v36  ;;  %v3135_v9 = vld [vmem:[#allocation7 + $0x110] ss:$8 sps:$4 sm:$0xff]  }
 0x2d1   :  { %v1672_v45 = vmul.f32 0.01, %v1656_v38  ;;  %v1634_v46 = vmul.f32 %v1622_v8, %v1605_v39  ;;  %vm1664_vm1 = vcmp.gt.f32.partialorder %v1656_v38, 0.0  ;;  %vm1667_vm2 = vcmp.gt.f32.partialorder %v1659_v40, 0.0  ;;  %v3170_v12 = vld [vmem:[#allocation7 + $0x1c4] ss:$8 sps:$4 sm:$0xff]  }
 0x2d2   :  { %v1661_v58 = vadd.f32 %v1643_v20, %v1632_v42  ;;  %v1660_v48 = vadd.f32 %v1639_v22, %v1631_v43  ;;  %v1681_v7 = vsel %vm1665_vm0, %v1657_v35, %v1673_v41  ;;  %v1675_v49 = vmul.f32 0.01, %v1659_v40  ;;  %v3149_v20 = vld [vmem:[#allocation7 + $0x154] ss:$8 sps:$4 sm:$0xff]   ;;  %v3147_v22 = vld [vmem:[#allocation7 + $0x150] ss:$8 sps:$4 sm:$0xff]  }
 0x2d3   :  { %v1663_v13 = vadd.f32 %v1651_v55, %v1634_v46  ;;  %v1633_v50 = vmul.f32 %v1618_v19, %v1604_v59  ;;  %v1680_v53 = vsel %vm1664_vm1, %v1656_v38, %v1672_v45  ;;  %vm1666_vm6 = vcmp.gt.f32.partialorder %v1658_v47, 0.0  ;;  %v3144_v19 = vld [vmem:[#allocation7 + $0x140] ss:$8 sps:$4 sm:$0xff]   ;;  %v3173_v33 = vld [vmem:[#allocation7 + $0x1d4] ss:$8 sps:$4 sm:$0xff]  }
 0x2d4   :  { %vm1669_vm3 = vcmp.gt.f32.partialorder %v1661_v58, 0.0  ;;  %v1677_v51 = vmul.f32 0.01, %v1661_v58  ;;  %vm1668_vm4 = vcmp.gt.f32.partialorder %v1660_v48, 0.0  ;;  %v1676_v52 = vmul.f32 0.01, %v1660_v48 }
 0x2d5   :  { %vm1671_vm5 = vcmp.gt.f32.partialorder %v1663_v13, 0.0  ;;  %v1679_v54 = vmul.f32 0.01, %v1663_v13  ;;  %v1662_v56 = vadd.f32 %v1647_v32, %v1633_v50  ;;  %v1674_v61 = vmul.f32 0.01, %v1658_v47 }
 0x2d6   :  { %v1685_v57 = vsel %vm1669_vm3, %v1661_v58, %v1677_v51  ;;  %v1684_v60 = vsel %vm1668_vm4, %v1660_v48, %v1676_v52  ;;  %v1683_v44 = vsel %vm1667_vm2, %v1659_v40, %v1675_v49  ;;  %v3156_v55 = vld [vmem:[#allocation7 + $0x180] ss:$8 sps:$4 sm:$0xff]   ;;  %v3165_v32 = vld [vmem:[#allocation7 + $0x1b0] ss:$8 sps:$4 sm:$0xff]   ;;  %v3176_v35 = vld [vmem:[#allocation7 + $0x1e4] ss:$8 sps:$4 sm:$0xff]  }
 0x2d7   :  { %v1689_v62 = vpack.c.bf16 %v1685_v57, %v1681_v7  ;;  %v1688_v15 = vpack.c.bf16 %v1684_v60, %v1680_v53  ;;  %v1687_v0 = vsel %vm1671_vm5, %v1663_v13, %v1679_v54  ;;  %vm1670_vm7 = vcmp.gt.f32.partialorder %v1662_v56, 0.0  ;;  %v3168_v21 = vld [vmem:[#allocation7 + $0x1c0] ss:$8 sps:$4 sm:$0xff]   ;;  %v3171_v34 = vld [vmem:[#allocation7 + $0x1d0] ss:$8 sps:$4 sm:$0xff]  }
 0x2d8   :  { %v1678_v3 = vmul.f32 0.01, %v1662_v56  ;;  %v1691_v4 = vpack.c.bf16 %v1687_v0, %v1683_v44  ;;  %v3548_v6 = vsel %vm1666_vm6, %v1658_v47, %v1674_v61  ;;  %v3174_v36 = vld [vmem:[#allocation7 + $0x1e0] ss:$8 sps:$4 sm:$0xff]   ;;  %v3179_v38 = vld [vmem:[#allocation7 + $0x1f4] ss:$8 sps:$4 sm:$0xff]  }
 0x2d9   :  { %2120 = vmatprep.mubr.bf16.mxu0 %v1689_v62  ;;  %v3177_v39 = vld [vmem:[#allocation7 + $0x1f0] ss:$8 sps:$4 sm:$0xff]   ;;  %v1756_v40 = vld [vmem:[%s3617_s6] sm:$0x3]  ;;  %v3182_v61 = vld [vmem:[#allocation8 + $0x48] sm:$0xff]  }
 0x2da   :  { %2121 = vmatmul.mubr.bf16.vlgmr.msra.gmra.mrb[4].mxu0 %v1688_v15  ;;  %v3550_v8 = vsel %vm1670_vm7, %v1662_v56, %v1678_v3  ;;  %v1761_v59 = vrot.slane %v1756_v40, %v3470_v28  ;;  %v1765_v42 = vrot.slane %v1756_v40, %v3475_v30  ;;  %v3180_v57 = vld [vmem:[#allocation8 + $0x40] sm:$0xff]   ;;  %v3183_v62 = vld [vmem:[#allocation8 + $0x8] sm:$0xff]   ;;  %v3185_v15 = vld [vmem:[#allocation8 + $0x10] sm:$0xff]  }
 0x2db   :  { %2132 = vmatpush1.bf16.msra.mxu0 %v3132_v63  ;;  %2163 = vmatprep.mubr.bf16.mxu0 %v1691_v4  ;;  %v1690_v10 = vpack.c.bf16 %v3550_v8, %v3548_v6  ;;  %v3181_v60 = vld [vmem:[#allocation8] sm:$0xff]   ;;  %v3184_v63 = vld [vmem:[#allocation8 + $0x50] sm:$0xff]   ;;  %v3186_v0 = vld [vmem:[#allocation8 + $0x58] sm:$0xff]  }
 0x2dc   :  { %2133 = vmatprep.subr.bf16.mxu0 %v3137_v2  ;;  %2729 = vmatprep.subr.bf16.mxu1 %v3180_v57  ;;  %v3187_v44 = vld [vmem:[#allocation8 + $0x18] sm:$0xff]   ;;  %v3188_v2 = vld [vmem:[#allocation8 + $0x60] sm:$0xff]   ;;  %v3190_v4 = vld [vmem:[#allocation8 + $0x68] sm:$0xff]  }
 0x2dd   :  { %2730 = vmatpush3.bf16.msra.mxu1 %v3181_v60  ;;  %v3189_v3 = vld [vmem:[#allocation8 + $0x20] sm:$0xff]   ;;  %v3191_v6 = vld [vmem:[#allocation8 + $0x28] sm:$0xff]   ;;  %v3192_v8 = vld [vmem:[#allocation8 + $0x70] sm:$0xff]  }
 0x2de   :  { %2731 = vmatprep.subr.bf16.mxu1 %v3182_v61 }
 0x2df   :  { %2134 = vmatpush1.bf16.msra.mxu0 %v3135_v9  ;;  %v3193_v9 = vld [vmem:[#allocation8 + $0x30] sm:$0xff]  }
 0x2e0   :  { %2135 = vmatprep.subr.bf16.mxu0 %v3140_v11  ;;  %v3195_v11 = vld [vmem:[#allocation8 + $0x38] sm:$0xff]  }
 0x2e1   :  { %2732 = vmatpush3.bf16.msra.mxu1 %v3183_v62  ;;  %v2712_v62 = vld [vmem:[%s3621_s10] ss:$0 sm:$0xff] }
 0x2e2   :  { %2733 = vmatprep.subr.bf16.mxu1 %v3184_v63 }
 0x2e3   :  { %2136 = vmatpush1.bf16.msra.mxu0 %v3138_v14 }
 0x2e4   :  { %2137 = vmatprep.subr.bf16.mxu0 %v3143_v16 }
 0x2e5   :  { %2734 = vmatpush3.bf16.msra.mxu1 %v3185_v15 }
 0x2e6   :  { %2735 = vmatprep.subr.bf16.mxu1 %v3186_v0 }
 0x2e7   :  { %2138 = vmatpush1.bf16.msra.mxu0 %v3141_v17 }
 0x2e8   :  { %2139 = vmatprep.subr.bf16.mxu0 %v3146_v18 }
 0x2e9   :  { %2736 = vmatpush3.bf16.msra.mxu1 %v3187_v44 }
 0x2ea   :  { %2737 = vmatprep.subr.bf16.mxu1 %v3188_v2 }
 0x2eb   :  { %2140 = vmatpush1.bf16.msra.mxu0 %v3144_v19 }
 0x2ec   :  { %2141 = vmatprep.subr.bf16.mxu0 %v3149_v20 }
 0x2ed   :  { %2738 = vmatpush3.bf16.msra.mxu1 %v3189_v3 }
 0x2ee   :  { %2739 = vmatprep.subr.bf16.mxu1 %v3190_v4 }
 0x2ef   :  { %2142 = vmatpush1.bf16.msra.mxu0 %v3147_v22 }
 0x2f0   :  { %2143 = vmatprep.subr.bf16.mxu0 %v3152_v23 }
 0x2f1   :  { %2740 = vmatpush3.bf16.msra.mxu1 %v3191_v6 }
 0x2f2   :  { %2741 = vmatprep.subr.bf16.mxu1 %v3192_v8 }
 0x2f3   :  { %2144 = vmatpush1.bf16.msra.mxu0 %v3150_v24 }
 0x2f4   :  { %2145 = vmatprep.subr.bf16.mxu0 %v3155_v25 }
 0x2f5   :  { %2742 = vmatpush3.bf16.msra.mxu1 %v3193_v9 }
 0x2f7   :  { %2146 = vmatpush1.bf16.msra.mxu0 %v3153_v26 }
 0x2f8   :  { %2147 = vmatprep.subr.bf16.mxu0 %v3158_v27 }
 0x2fb   :  { %2148 = vmatpush1.bf16.msra.mxu0 %v3156_v55 }
 0x2fc   :  { %2149 = vmatprep.subr.bf16.mxu0 %v3161_v37 }
 0x2ff   :  { %2150 = vmatpush1.bf16.msra.mxu0 %v3159_v1 }
 0x300   :  { %2151 = vmatprep.subr.bf16.mxu0 %v3164_v29 }
 0x303   :  { %2152 = vmatpush1.bf16.msra.mxu0 %v3162_v5  ;;  %v2174_v5 = vld [vmem:[%s3618_s7] sm:$0x3] }
 0x304   :  { %2153 = vmatprep.subr.bf16.mxu0 %v3167_v31  ;;  %v2175_v31 = vld [vmem:[%s3619_s8] sm:$0x3] }
 0x307   :  { %2154 = vmatpush1.bf16.msra.mxu0 %v3165_v32 }
 0x308   :  { %2155 = vmatprep.subr.bf16.mxu0 %v3170_v12 }
 0x30b   :  { %2156 = vmatpush1.bf16.msra.mxu0 %v3168_v21  ;;  %v2219_v21 = vrot.slane %v2174_v5, %v3470_v28 }
 0x30c   :  { %2157 = vmatprep.subr.bf16.mxu0 %v3173_v33  ;;  %v2223_v33 = vrot.slane %v2174_v5, %v3475_v30 }
 0x30f   :  { %2158 = vmatpush1.bf16.msra.mxu0 %v3171_v34 }
 0x310   :  { %2159 = vmatprep.subr.bf16.mxu0 %v3176_v35  ;;  %v2234_v35 = vrot.slane %v2175_v31, %v3470_v28 }
 0x313   :  { %2160 = vmatpush1.bf16.msra.mxu0 %v3174_v36  ;;  %v2238_v36 = vrot.slane %v2175_v31, %v3475_v30 }
 0x314   :  { %2161 = vmatprep.subr.bf16.mxu0 %v3179_v38 }
 0x317   :  { %2162 = vmatpush1.bf16.msra.mxu0 %v3177_v39 }
 0x31a   :  { %2164 = vmatmul.mubr.bf16.vlgmr.msra.gmra.mrb[4].mxu0 %v1690_v10  ;;  %v3194_v10 = vld [vmem:[#allocation8 + $0x78] sm:$0xff]  }
 0x31b   :  { %2743 = vmatprep.subr.bf16.mxu1 %v3194_v10 }
 0x31c   :  { %2744 = vmatpush3.bf16.msra.mxu1 %v3195_v11 }
 0x3ed   :  { %v2165_v41 = vpop.f32.mrb[4].mxu0 }
 0x3ee   :  { %v3559_v43 = vadd.f32 %v2165_v41, %v1761_v59  ;;  %v2167_v45 = vpop.f32.mrb[5].mxu0 }
 0x3ef   :  { %v3561_v46 = vadd.f32 %v2167_v45, %v1765_v42  ;;  %v2169_v47 = vpop.f32.mrb[6].mxu0 }
 0x3f0   :  { %v3563_v58 = vadd.f32 %v2169_v47, %v1761_v59  ;;  %v2171_v48 = vpop.f32.mrb[7].mxu0  ;;  %v2185_v49 = vmul.f32 %v3559_v43, %v3559_v43 }
 0x3f1   :  { %v3565_v7 = vadd.f32 %v2171_v48, %v1765_v42  ;;  %v2176_v13 = vadd.f32 %v3561_v46, %v3559_v43  ;;  %v2186_v50 = vmul.f32 %v3561_v46, %v3561_v46 }
 0x3f2   :  { %v2187_v52 = vmul.f32 %v3563_v58, %v3563_v58 }
 0x3f3   :  { %2177 = vadd.xlane.f32.xlu0 %v2176_v13  ;;  %v2179_v51 = vadd.f32 %v3565_v7, %v3563_v58  ;;  %v2188_v53 = vmul.f32 %v3565_v7, %v3565_v7  ;;  %v2189_v54 = vadd.f32 %v2186_v50, %v2185_v49 }
 0x3f5   :  { %2180 = vadd.xlane.f32.xlu1 %v2179_v51  ;;  %v2192_v56 = vadd.f32 %v2188_v53, %v2187_v52 }
 0x3f7   :  { %2190 = vadd.xlane.f32.xlu0 %v2189_v54 }
 0x3f9   :  { %2193 = vadd.xlane.f32.xlu1 %v2192_v56 }
 0x480   :  { %v2178_v14 = vpop.xlane.xlu0 %2177 }
 0x481   :  { %v2183_v16 = vmul.f32 0.00390625, %v2178_v14 }
 0x482   :  { %v2181_v17 = vpop.xlane.xlu1 %2180 }
 0x483   :  { %v2184_v18 = vmul.f32 0.00390625, %v2181_v17  ;;  %v2197_v20 = vmul.f32 %v2183_v16, %v2183_v16  ;;  %v2203_v32 = vsub.f32 %v3559_v43, %v2183_v16  ;;  %v2204_v12 = vsub.f32 %v3561_v46, %v2183_v16 }
 0x484   :  { %v2191_v19 = vpop.xlane.xlu0 %2190 }
 0x485   :  { %v2195_v22 = vmul.f32 0.00390625, %v2191_v19  ;;  %v2198_v25 = vmul.f32 %v2184_v18, %v2184_v18  ;;  %v2205_v38 = vsub.f32 %v3563_v58, %v2184_v18  ;;  %v2206_v39 = vsub.f32 %v3565_v7, %v2184_v18 }
 0x486   :  { %v2194_v23 = vpop.xlane.xlu1 %2193 }
 0x487   :  { %v2199_v24 = vsub.f32 %v2195_v22, %v2197_v20  ;;  %v2196_v26 = vmul.f32 0.00390625, %v2194_v23 }
 0x489   :  { %v2201_v27 = vmax.f32 %v2199_v24, 0.0  ;;  %v2200_v55 = vsub.f32 %v2196_v26, %v2198_v25 }
 0x48b   :  { %v2207_v37 = vadd.f32 1e-05, %v2201_v27  ;;  %v2202_v1 = vmax.f32 %v2200_v55, 0.0 }
 0x48d   :  { %3200 = vrsqrt.f32 %v2207_v37  ;;  %v2208_v29 = vadd.f32 1e-05, %v2202_v1 }
 0x48f   :  { %3202 = vrsqrt.f32 %v2208_v29 }
 0x497   :  { %v3201_v34 = vpop.eup %3200 }
 0x498   :  { %v2211_v40 = vmul.f32 %v3201_v34, %v2203_v32  ;;  %v2212_v59 = vmul.f32 %v3201_v34, %v2204_v12 }
 0x499   :  { %v3203_v42 = vpop.eup %3202 }
 0x49a   :  { %v2213_v41 = vmul.f32 %v3203_v42, %v2205_v38  ;;  %v2214_v43 = vmul.f32 %v3203_v42, %v2206_v39  ;;  %v2227_v45 = vmul.f32 %v2223_v33, %v2212_v59  ;;  %v2226_v46 = vmul.f32 %v2219_v21, %v2211_v40 }
 0x49c   :  { %v2229_v47 = vmul.f32 %v2223_v33, %v2214_v43  ;;  %v2242_v48 = vadd.f32 %v2238_v36, %v2227_v45  ;;  %v2228_v13 = vmul.f32 %v2219_v21, %v2213_v41  ;;  %v2241_v49 = vadd.f32 %v2234_v35, %v2226_v46 }
 0x49e   :  { %v2244_v50 = vadd.f32 %v2238_v36, %v2229_v47  ;;  %v2250_v51 = vmul.f32 0.01, %v2242_v48  ;;  %v2243_v28 = vadd.f32 %v2234_v35, %v2228_v13  ;;  %vm2246_vm8 = vcmp.gt.f32.partialorder %v2242_v48, 0.0 }
 0x49f   :  { %v2249_v30 = vmul.f32 0.01, %v2241_v49  ;;  %vm2245_vm10 = vcmp.gt.f32.partialorder %v2241_v49, 0.0 }
 0x4a0   :  { %vm2248_vm9 = vcmp.gt.f32.partialorder %v2244_v50, 0.0  ;;  %v2252_v58 = vmul.f32 0.01, %v2244_v50  ;;  %vm2247_vm11 = vcmp.gt.f32.partialorder %v2243_v28, 0.0  ;;  %v2251_v7 = vmul.f32 0.01, %v2243_v28 }
 0x4a1   :  { %v2254_v52 = vsel %vm2246_vm8, %v2242_v48, %v2250_v51  ;;  %v2253_v56 = vsel %vm2245_vm10, %v2241_v49, %v2249_v30 }
 0x4a2   :  { %v2256_v53 = vsel %vm2248_vm9, %v2244_v50, %v2252_v58  ;;  %v2255_v57 = vsel %vm2247_vm11, %v2243_v28, %v2251_v7 }
 0x4a3   :  { %v2258_v54 = vpack.c.bf16 %v2256_v53, %v2254_v52  ;;  %v2257_v60 = vpack.c.bf16 %v2255_v57, %v2253_v56 }
 0x4a5   :  { %2426 = vmatprep.mubr.bf16.mxu1 %v2258_v54 }
 0x4a6   :  { %2427 = vmatmul.mubr.bf16.vlgmr.msra.gmra.mrb[8].mxu1 %v2257_v60 }
 0x579   :  { %v2745_v61 = vpop.f32.mrb[8].mxu1 }
 0x57a   :  { %v2746_v63 = vpop.f32.mrb[9].mxu1 }
 0x57b   :  { %v2747_v15 = vadd.f32 %v2746_v63, %v2745_v61  ;;  %v2748_v0 = vpop.f32.mrb[10].mxu1 }
 0x57c   :  { %v2749_v44 = vpop.f32.mrb[11].mxu1 }
 0x57d   :  { %v2429_v2 = vadd.f32 %v2747_v15, %v2712_v62  ;;  %v2750_v3 = vadd.f32 %v2749_v44, %v2748_v0 }
 0x57f   :  { %2435 = vst [vmem:[#allocation10] sm:$0xff] %v2429_v2  ;;  %v2432_v4 = vadd.f32 %v2750_v3, %v2712_v62 }
 0x581   :  { %2436 = vst [vmem:[#allocation10 + $0x8] sm:$0xff] %v2432_v4 }
 0x582   :  { %3303 = shalt.err (!%p3300_p8)
}
 0x583   :  { %s3304_s23 = scalar_lea.hbm %s3622_s11, 256 }
 0x584   :  { %p3305_p9 = scmp.ne.s32.totalorder %s3622_s11, %s3304_s23  ;;  %p3308_p10 = scmp.lt.u32.totalorder %s3304_s23, %s3622_s11 }
 0x586   :  { %p3310_p11 = pnand %p3308_p10, %p3305_p9 }
 0x588   :  { %3313 = shalt.err (!%p3310_p11)
}
 0x589   :  { %2448 = dma.vmem_to_hbm [thread:$0]  %s2443_s22, 256, %s3622_s11, [#allocation4], %s3329_s0, %s3329_s0, %s3330_s13  }
 0x58a   :  { %3320 = dma.done.wait [#allocation4], 256  }
 0x58b   :  { %3321 = vsyncadd [#allocation4], 4294967040 }
 0x58c   :  { %2452 = vsyncpa [#allocation3], 1 }
 0x58d   :  { %2453 = vsyncpa [#allocation6], 1 }
 0x58e   :  { %2454 = vsyncpa [#allocation9], 1 }
 0x58f   :  { %2455 = vsyncpa [#allocation4], 1 }

</bundles_post_ra>
